<compile_context>
chip_gen: v6e
topology: v6e:2x2x1
jax: 0.10.0
libtpu: 0.0.40
codegen_flags: <defaults>
</compile_context>

<pallas_src>
import functools

import jax
import jax.numpy as jnp
import numpy as np
from jax.experimental import pallas as pl
from jax.experimental.pallas import tpu as pltpu


# ----------------------------------------------------------------------------
# Hyper-parameters of the module (compile-time constants, from `args`)
# ----------------------------------------------------------------------------
NUM_WORDS = 64
EMBED_SIZE = 32          # E
N_LABELS = 3
WINDOW_SIZE = 8          # W
NUM_SAMPLED = 8          # args.negs  (must equal W so that `w_in * noise`
                         # in the reference code is a valid elementwise product)
BATCH_SIZE = 8           # B
PRIOR_W = 0.5            # args.prior_weight
SIGMA_1 = 1.0            # args.sigma_1
SIGMA_2 = 0.2            # args.sigma_2


# ----------------------------------------------------------------------------
# In-kernel math helpers (numerically stable, EUP-lean)
# ----------------------------------------------------------------------------
def _softplus(x):
    """softplus(x) = max(x,0) + log(1 + exp(-|x|)) — no overflow."""
    return jnp.maximum(x, 0.0) + jnp.log(1.0 + jnp.exp(-jnp.abs(x)))


def _log_sigmoid(x):
    """log(sigmoid(x)) = -softplus(-x) — no underflow to -inf."""
    z = -x
    return -(jnp.maximum(z, 0.0) + jnp.log(1.0 + jnp.exp(-jnp.abs(z))))


def _sum_all(x):
    """(R, C) -> (1, 1): lane reduce then sublane reduce."""
    return jnp.sum(jnp.sum(x, axis=1, keepdims=True), axis=0, keepdims=True)


def _prior_logpdf_total(w, pr_w, s1, s2):
    """sum_ij log( pr_w*exp(-w^2/(2 s1^2)) + (1-pr_w)*exp(-w^2/(2 s2^2)) )

    Rewritten with the slower-decaying Gaussian factored out so it needs a
    single exp + single log per element and never hits log(0).
    """
    t = w * w
    c1 = 1.0 / (2.0 * s1 * s1)
    c2 = 1.0 / (2.0 * s2 * s2)
    if c1 <= c2:  # s1 >= s2: factor out the s1 component
        base_c, base_w, other_c, other_w = c1, pr_w, c2, 1.0 - pr_w
    else:
        base_c, base_w, other_c, other_w = c2, 1.0 - pr_w, c1, pr_w
    val = -base_c * t + jnp.log(base_w + other_w * jnp.exp(-(other_c - base_c) * t))
    return _sum_all(val)                                   # (1, 1)


# ----------------------------------------------------------------------------
# Pallas kernel (single invocation over the full problem)
# ----------------------------------------------------------------------------
def bbp_kernel(wt_ref,                                      # SMEM (1,1) f32
               cat_ref,                                     # (N, 2E) = [mu_in | y]
               rho_in_ref, eps_in_ref,
               mu_out_ref, rho_out_ref, eps_out_ref, noise_ref,
               w_ref, b_ref,                                # (2E, E), (1, E)
               loss_ref,                                    # (1, 1) output
               *, pr_w, s1, s2, inv_n):
    wt = wt_ref[0, 0]

    # Fused linear layer: cat([mu_in, y], 1) @ [[W1],[W2]] + b  (one MXU pass)
    lin = jnp.dot(cat_ref[...], w_ref[...],
                  preferred_element_type=jnp.float32) + b_ref[...]

    rho_in = rho_in_ref[...]
    eps_in = eps_in_ref[...]
    rho_out = rho_out_ref[...]
    eps_out = eps_out_ref[...]

    # reparameterized weights
    sig_in = _softplus(rho_in)
    sig_out = _softplus(rho_out)
    w_in = jnp.tanh(lin) + sig_in * eps_in
    w_out = mu_out_ref[...] + sig_out * eps_out

    # posterior log-density totals (per-row sums deferred into a grand total,
    # which is valid because the final loss is a mean over rows of a sum)
    post_total = (-0.5 * (_sum_all(eps_in * eps_in) + _sum_all(eps_out * eps_out))
                  - _sum_all(jnp.log(sig_in))
                  - _sum_all(jnp.log(sig_out)))

    # mixture-of-Gaussians prior totals
    prior_total = (_prior_logpdf_total(w_in, pr_w, s1, s2)
                   + _prior_logpdf_total(w_out, pr_w, s1, s2))

    # negative-sampling likelihood: per-row dot products, then total
    dot_t = jnp.sum(w_in * w_out, axis=1, keepdims=True)            # (N, 1)
    dot_n = jnp.sum(w_in * noise_ref[...], axis=1, keepdims=True)   # (N, 1)
    lik_total = jnp.sum(_log_sigmoid(dot_t) + _log_sigmoid(dot_n),
                        axis=0, keepdims=True)                      # (1, 1)

    # mean-over-rows loss, emitted as a single scalar
    loss_ref[...] = (wt * (post_total - prior_total) - lik_total) * inv_n


def bbp_forward_pallas(wt, mu_in, y, rho_in, eps_in,
                       mu_out, rho_out, eps_out, noise,
                       w1, w2, b):
    n, e = mu_in.shape
    assert noise.shape == (n, e), (
        "reference semantics require num_sampled == window_size")

    # Fuse the two matmuls of linear(cat([mu_in, y], 1)) in the wrapper.
    cat_in = jnp.concatenate([mu_in, y], axis=1)        # (N, 2E)
    w_cat = jnp.concatenate([w1, w2], axis=0)           # (2E, E)

    wt_spec = pl.BlockSpec(memory_space=pltpu.MemorySpace.SMEM)
    cat_spec = pl.BlockSpec((n, 2 * e), lambda i: (0, 0))
    row_spec = pl.BlockSpec((n, e), lambda i: (0, 0))
    w_spec = pl.BlockSpec((2 * e, e), lambda i: (0, 0))
    b_spec = pl.BlockSpec((1, e), lambda i: (0, 0))
    out_spec = pl.BlockSpec((1, 1), lambda i: (0, 0))

    kernel = functools.partial(bbp_kernel, pr_w=PRIOR_W, s1=SIGMA_1,
                               s2=SIGMA_2, inv_n=1.0 / n)

    loss_out = pl.pallas_call(
        kernel,
        out_shape=jax.ShapeDtypeStruct((1, 1), jnp.float32),
        grid_spec=pltpu.PrefetchScalarGridSpec(
            num_scalar_prefetch=0,
            grid=(1,),                                   # single step: whole
            in_specs=[wt_spec, cat_spec,                 # problem fits VMEM
                      row_spec, row_spec,                # on v5e/v6e/v7x
                      row_spec, row_spec, row_spec, row_spec,
                      w_spec, b_spec],
            out_specs=out_spec,
        ),
        compiler_params=pltpu.CompilerParams(
            dimension_semantics=("arbitrary",)),         # don't shard a 1-step
    )(wt, cat_in, rho_in, eps_in, mu_out, rho_out, eps_out, noise, w_cat, b)

    return loss_out[0, 0]


# ----------------------------------------------------------------------------
# Pure-JAX reference (mirrors the PyTorch module's math exactly)
# ----------------------------------------------------------------------------
def _compute_prior_ref(w):
    n1 = PRIOR_W * jnp.exp(-(w ** 2) / (2.0 * SIGMA_1 ** 2))
    n2 = (1.0 - PRIOR_W) * jnp.exp(-(w ** 2) / (2.0 * SIGMA_2 ** 2))
    return jnp.sum(jnp.log(n1 + n2), axis=1)


def bbp_forward_ref(wt, mu_in, y, rho_in, eps_in,
                    mu_out, rho_out, eps_out, noise, w1, w2, b):
    lin = mu_in @ w1 + y @ w2 + b
    sig_in = jnp.log(jnp.exp(rho_in) + 1.0)
    w_in = jnp.tanh(lin) + sig_in * eps_in
    post_in = -0.5 * jnp.sum(eps_in ** 2, 1) - jnp.sum(jnp.log(sig_in), 1)
    prior_in = _compute_prior_ref(w_in)
    sig_out = jnp.log(jnp.exp(rho_out) + 1.0)
    w_out = mu_out + sig_out * eps_out
    post_out = -0.5 * jnp.sum(eps_out ** 2, 1) - jnp.sum(jnp.log(sig_out), 1)
    prior_out = _compute_prior_ref(w_out)
    log_target = jnp.log(jax.nn.sigmoid(jnp.sum(w_in * w_out, 1)))
    log_sampled = jnp.log(jax.nn.sigmoid(jnp.sum(w_in * noise, 1)))
    loss = wt[0, 0] * (post_in + post_out - prior_in - prior_out) \
        - (log_target + log_sampled)
    return jnp.mean(loss)


# ----------------------------------------------------------------------------
# Parameter init + glue (embedding lookups, noise sampling)
# ----------------------------------------------------------------------------
def main():
    assert NUM_SAMPLED == WINDOW_SIZE, \
        "reference model implicitly requires negs == window_size"

    key = jax.random.PRNGKey(0)
    keys = jax.random.split(key, 12)

    # Parameters (uniform(-1, 1) like the PyTorch module)
    in_embed = jax.random.uniform(keys[0], (NUM_WORDS, EMBED_SIZE),
                                  jnp.float32, -1.0, 1.0)
    out_embed = jax.random.uniform(keys[1], (NUM_WORDS, EMBED_SIZE),
                                   jnp.float32, -1.0, 1.0)
    in_rho = jax.random.uniform(keys[2], (NUM_WORDS, EMBED_SIZE),
                                jnp.float32, -1.0, 1.0)
    out_rho = jax.random.uniform(keys[3], (NUM_WORDS, EMBED_SIZE),
                                 jnp.float32, -1.0, 1.0)
    covariates = jax.random.uniform(keys[4], (N_LABELS, EMBED_SIZE),
                                    jnp.float32, -1.0, 1.0)
    bound = 1.0 / np.sqrt(2 * EMBED_SIZE)
    lin_w = jax.random.uniform(keys[5], (EMBED_SIZE, 2 * EMBED_SIZE),
                               jnp.float32, -bound, bound)   # torch Linear: (out, in)
    lin_b = jax.random.uniform(keys[6], (EMBED_SIZE,),
                               jnp.float32, -bound, bound)
    w1 = lin_w[:, :EMBED_SIZE].T                              # (E, E)
    w2 = lin_w[:, EMBED_SIZE:].T                              # (E, E)
    b = lin_b[None, :]                                        # (1, E)

    # Forward inputs
    B, W, E = BATCH_SIZE, WINDOW_SIZE, EMBED_SIZE
    N = B * W
    inputs = jax.random.randint(keys[7], (B, 1), 0, NUM_WORDS)        # (B, 1)
    outputs = jax.random.randint(keys[8], (B, W), 0, NUM_WORDS)       # (B, W)
    covars = jax.random.randint(keys[9], (B, 1), 0, N_LABELS)         # (B, 1)
    wt = jnp.array([[0.5]], dtype=jnp.float32)                        # scalar weight

    # --- glue: embedding gathers + reshape (B,1|W,E) -> (B*W, E) ---
    y = covariates[jnp.broadcast_to(covars, (B, W)).reshape(-1)]      # (N, E)

    mu_in = jnp.broadcast_to(in_embed[inputs], (B, W, E)).reshape(N, E)
    rho_in = jnp.broadcast_to(in_rho[inputs], (B, W, E)).reshape(N, E)
    eps_in = jnp.broadcast_to(
        jax.random.normal(keys[10], (B, 1, E), jnp.float32), (B, W, E)
    ).reshape(N, E)                                                   # same eps per window

    mu_out = out_embed[outputs].reshape(N, E)
    rho_out = out_rho[outputs].reshape(N, E)
    eps_out = jax.random.normal(keys[11], (B, W, E), jnp.float32).reshape(N, E)

    # negative samples (self.weights is None branch: uniform word indices)
    noise_idx = jax.random.randint(jax.random.fold_in(key, 99),
                                   (B, NUM_SAMPLED), 0, NUM_WORDS - 1)
    noise = (-out_embed[noise_idx]).reshape(-1, E)                    # (B*negs, E) == (N, E)

    args = (wt, mu_in, y, rho_in, eps_in, mu_out, rho_out, eps_out,
            noise, w1, w2, b)

    loss = jax.block_until_ready(bbp_forward_pallas(*args))
    loss_ref = jax.block_until_ready(bbp_forward_ref(*args))
    np.testing.assert_allclose(np.asarray(loss), np.asarray(loss_ref),
                               rtol=1e-4, atol=1e-4)
    print("KERNEL_OK")


if __name__ == "__main__":
    main()
</pallas_src>

<mosaic_0001>
module attributes {stable_mosaic.version = 11 : i64} {
  func.func @bbp_kernel(%arg0: i32, %arg1: memref<1x1xf32, #tpu.memory_space<smem>>, %arg2: memref<64x64xf32, #tpu.memory_space<vmem>>, %arg3: memref<64x32xf32, #tpu.memory_space<vmem>>, %arg4: memref<64x32xf32, #tpu.memory_space<vmem>>, %arg5: memref<64x32xf32, #tpu.memory_space<vmem>>, %arg6: memref<64x32xf32, #tpu.memory_space<vmem>>, %arg7: memref<64x32xf32, #tpu.memory_space<vmem>>, %arg8: memref<64x32xf32, #tpu.memory_space<vmem>>, %arg9: memref<64x32xf32, #tpu.memory_space<vmem>>, %arg10: memref<1x32xf32, #tpu.memory_space<vmem>>, %arg11: memref<1x1xf32, #tpu.memory_space<vmem>>) attributes {dimension_semantics = [#tpu.dimension_semantics<arbitrary>], iteration_bounds = array<i64: 1>, scalar_prefetch = 0 : i64, scratch_operands = 0 : i64, tpu.core_type = #tpu.core_type<tc>, window_params = [{transform_indices = @transform_0, window_bounds = array<i64: 1, 1>}, {pipeline_mode = #tpu.pipeline_mode<synchronous>, transform_indices = @transform_1, window_bounds = array<i64: 64, 64>}, {pipeline_mode = #tpu.pipeline_mode<synchronous>, transform_indices = @transform_2, window_bounds = array<i64: 64, 32>}, {pipeline_mode = #tpu.pipeline_mode<synchronous>, transform_indices = @transform_3, window_bounds = array<i64: 64, 32>}, {pipeline_mode = #tpu.pipeline_mode<synchronous>, transform_indices = @transform_4, window_bounds = array<i64: 64, 32>}, {pipeline_mode = #tpu.pipeline_mode<synchronous>, transform_indices = @transform_5, window_bounds = array<i64: 64, 32>}, {pipeline_mode = #tpu.pipeline_mode<synchronous>, transform_indices = @transform_6, window_bounds = array<i64: 64, 32>}, {pipeline_mode = #tpu.pipeline_mode<synchronous>, transform_indices = @transform_7, window_bounds = array<i64: 64, 32>}, {pipeline_mode = #tpu.pipeline_mode<synchronous>, transform_indices = @transform_8, window_bounds = array<i64: 64, 32>}, {pipeline_mode = #tpu.pipeline_mode<synchronous>, transform_indices = @transform_9, window_bounds = array<i64: 1, 32>}, {pipeline_mode = #tpu.pipeline_mode<synchronous>, transform_indices = @transform_10, window_bounds = array<i64: 1, 1>}]} {
    %c0 = arith.constant 0 : index
    %c0_0 = arith.constant 0 : index
    %0 = memref.load %arg1[%c0, %c0_0] : memref<1x1xf32, #tpu.memory_space<smem>>
    %c0_1 = arith.constant 0 : index
    %c0_2 = arith.constant 0 : index
    %1 = vector.load %arg2[%c0_1, %c0_2] : memref<64x64xf32, #tpu.memory_space<vmem>>, vector<64x64xf32>
    %c0_3 = arith.constant 0 : index
    %c0_4 = arith.constant 0 : index
    %2 = vector.load %arg9[%c0_3, %c0_4] : memref<64x32xf32, #tpu.memory_space<vmem>>, vector<64x32xf32>
    %cst = arith.constant dense<0.000000e+00> : vector<64x32xf32>
    %3 = tpu.matmul %1, %2, %cst {dimension_numbers = #tpu.dot_dimension_numbers<[1], [0], [0], [1], [0, 0, 1, 1], [], []>} : vector<64x64xf32>, vector<64x32xf32>, vector<64x32xf32> -> vector<64x32xf32>
    %c0_5 = arith.constant 0 : index
    %c0_6 = arith.constant 0 : index
    %4 = vector.load %arg10[%c0_5, %c0_6] : memref<1x32xf32, #tpu.memory_space<vmem>>, vector<1x32xf32>
    %5 = vector.broadcast %4 : vector<1x32xf32> to vector<64x32xf32>
    %6 = arith.addf %3, %5 : vector<64x32xf32>
    %c0_7 = arith.constant 0 : index
    %c0_8 = arith.constant 0 : index
    %7 = vector.load %arg3[%c0_7, %c0_8] : memref<64x32xf32, #tpu.memory_space<vmem>>, vector<64x32xf32>
    %c0_9 = arith.constant 0 : index
    %c0_10 = arith.constant 0 : index
    %8 = vector.load %arg4[%c0_9, %c0_10] : memref<64x32xf32, #tpu.memory_space<vmem>>, vector<64x32xf32>
    %c0_11 = arith.constant 0 : index
    %c0_12 = arith.constant 0 : index
    %9 = vector.load %arg6[%c0_11, %c0_12] : memref<64x32xf32, #tpu.memory_space<vmem>>, vector<64x32xf32>
    %c0_13 = arith.constant 0 : index
    %c0_14 = arith.constant 0 : index
    %10 = vector.load %arg7[%c0_13, %c0_14] : memref<64x32xf32, #tpu.memory_space<vmem>>, vector<64x32xf32>
    %cst_15 = arith.constant 0.000000e+00 : f32
    %11 = vector.broadcast %cst_15 : f32 to vector<64x32xf32>
    %12 = arith.maximumf %7, %11 : vector<64x32xf32>
    %13 = math.absf %7 : vector<64x32xf32>
    %cst_16 = arith.constant 0.000000e+00 : f32
    %14 = vector.broadcast %cst_16 : f32 to vector<64x32xf32>
    %15 = arith.subf %14, %13 : vector<64x32xf32>
    %16 = math.exp %15 : vector<64x32xf32>
    %cst_17 = arith.constant 1.000000e+00 : f32
    %17 = vector.broadcast %cst_17 : f32 to vector<64x32xf32>
    %18 = arith.addf %17, %16 : vector<64x32xf32>
    %19 = math.log %18 : vector<64x32xf32>
    %20 = arith.addf %12, %19 : vector<64x32xf32>
    %cst_18 = arith.constant 0.000000e+00 : f32
    %21 = vector.broadcast %cst_18 : f32 to vector<64x32xf32>
    %22 = arith.maximumf %9, %21 : vector<64x32xf32>
    %23 = math.absf %9 : vector<64x32xf32>
    %cst_19 = arith.constant 0.000000e+00 : f32
    %24 = vector.broadcast %cst_19 : f32 to vector<64x32xf32>
    %25 = arith.subf %24, %23 : vector<64x32xf32>
    %26 = math.exp %25 : vector<64x32xf32>
    %cst_20 = arith.constant 1.000000e+00 : f32
    %27 = vector.broadcast %cst_20 : f32 to vector<64x32xf32>
    %28 = arith.addf %27, %26 : vector<64x32xf32>
    %29 = math.log %28 : vector<64x32xf32>
    %30 = arith.addf %22, %29 : vector<64x32xf32>
    %31 = math.tanh %6 : vector<64x32xf32>
    %32 = arith.mulf %20, %8 : vector<64x32xf32>
    %33 = arith.addf %31, %32 : vector<64x32xf32>
    %c0_21 = arith.constant 0 : index
    %c0_22 = arith.constant 0 : index
    %34 = vector.load %arg5[%c0_21, %c0_22] : memref<64x32xf32, #tpu.memory_space<vmem>>, vector<64x32xf32>
    %35 = arith.mulf %30, %10 : vector<64x32xf32>
    %36 = arith.addf %34, %35 : vector<64x32xf32>
    %37 = arith.mulf %8, %8 : vector<64x32xf32>
    %cst_23 = arith.constant dense<0.000000e+00> : vector<64xf32>
    %38 = vector.multi_reduction <add>, %37, %cst_23 [1] : vector<64x32xf32> to vector<64xf32>
    %39 = vector.shape_cast %38 : vector<64xf32> to vector<64x1xf32>
    %cst_24 = arith.constant dense<0.000000e+00> : vector<1xf32>
    %40 = vector.multi_reduction <add>, %39, %cst_24 [0] : vector<64x1xf32> to vector<1xf32>
    %41 = vector.shape_cast %40 : vector<1xf32> to vector<1x1xf32>
    %42 = arith.mulf %10, %10 : vector<64x32xf32>
    %cst_25 = arith.constant dense<0.000000e+00> : vector<64xf32>
    %43 = vector.multi_reduction <add>, %42, %cst_25 [1] : vector<64x32xf32> to vector<64xf32>
    %44 = vector.shape_cast %43 : vector<64xf32> to vector<64x1xf32>
    %cst_26 = arith.constant dense<0.000000e+00> : vector<1xf32>
    %45 = vector.multi_reduction <add>, %44, %cst_26 [0] : vector<64x1xf32> to vector<1xf32>
    %46 = vector.shape_cast %45 : vector<1xf32> to vector<1x1xf32>
    %47 = arith.addf %41, %46 : vector<1x1xf32>
    %cst_27 = arith.constant -5.000000e-01 : f32
    %48 = vector.broadcast %cst_27 : f32 to vector<1x1xf32>
    %49 = arith.mulf %48, %47 : vector<1x1xf32>
    %50 = math.log %20 : vector<64x32xf32>
    %cst_28 = arith.constant dense<0.000000e+00> : vector<64xf32>
    %51 = vector.multi_reduction <add>, %50, %cst_28 [1] : vector<64x32xf32> to vector<64xf32>
    %52 = vector.shape_cast %51 : vector<64xf32> to vector<64x1xf32>
    %cst_29 = arith.constant dense<0.000000e+00> : vector<1xf32>
    %53 = vector.multi_reduction <add>, %52, %cst_29 [0] : vector<64x1xf32> to vector<1xf32>
    %54 = vector.shape_cast %53 : vector<1xf32> to vector<1x1xf32>
    %55 = arith.subf %49, %54 : vector<1x1xf32>
    %56 = math.log %30 : vector<64x32xf32>
    %cst_30 = arith.constant dense<0.000000e+00> : vector<64xf32>
    %57 = vector.multi_reduction <add>, %56, %cst_30 [1] : vector<64x32xf32> to vector<64xf32>
    %58 = vector.shape_cast %57 : vector<64xf32> to vector<64x1xf32>
    %cst_31 = arith.constant dense<0.000000e+00> : vector<1xf32>
    %59 = vector.multi_reduction <add>, %58, %cst_31 [0] : vector<64x1xf32> to vector<1xf32>
    %60 = vector.shape_cast %59 : vector<1xf32> to vector<1x1xf32>
    %61 = arith.subf %55, %60 : vector<1x1xf32>
    %62 = arith.mulf %33, %33 : vector<64x32xf32>
    %cst_32 = arith.constant -5.000000e-01 : f32
    %63 = vector.broadcast %cst_32 : f32 to vector<64x32xf32>
    %64 = arith.mulf %63, %62 : vector<64x32xf32>
    %cst_33 = arith.constant -1.200000e+01 : f32
    %65 = vector.broadcast %cst_33 : f32 to vector<64x32xf32>
    %66 = arith.mulf %65, %62 : vector<64x32xf32>
    %67 = math.exp %66 : vector<64x32xf32>
    %cst_34 = arith.constant 5.000000e-01 : f32
    %68 = vector.broadcast %cst_34 : f32 to vector<64x32xf32>
    %69 = arith.mulf %68, %67 : vector<64x32xf32>
    %cst_35 = arith.constant 5.000000e-01 : f32
    %70 = vector.broadcast %cst_35 : f32 to vector<64x32xf32>
    %71 = arith.addf %70, %69 : vector<64x32xf32>
    %72 = math.log %71 : vector<64x32xf32>
    %73 = arith.addf %64, %72 : vector<64x32xf32>
    %cst_36 = arith.constant dense<0.000000e+00> : vector<64xf32>
    %74 = vector.multi_reduction <add>, %73, %cst_36 [1] : vector<64x32xf32> to vector<64xf32>
    %75 = vector.shape_cast %74 : vector<64xf32> to vector<64x1xf32>
    %cst_37 = arith.constant dense<0.000000e+00> : vector<1xf32>
    %76 = vector.multi_reduction <add>, %75, %cst_37 [0] : vector<64x1xf32> to vector<1xf32>
    %77 = vector.shape_cast %76 : vector<1xf32> to vector<1x1xf32>
    %78 = arith.mulf %36, %36 : vector<64x32xf32>
    %cst_38 = arith.constant -5.000000e-01 : f32
    %79 = vector.broadcast %cst_38 : f32 to vector<64x32xf32>
    %80 = arith.mulf %79, %78 : vector<64x32xf32>
    %cst_39 = arith.constant -1.200000e+01 : f32
    %81 = vector.broadcast %cst_39 : f32 to vector<64x32xf32>
    %82 = arith.mulf %81, %78 : vector<64x32xf32>
    %83 = math.exp %82 : vector<64x32xf32>
    %cst_40 = arith.constant 5.000000e-01 : f32
    %84 = vector.broadcast %cst_40 : f32 to vector<64x32xf32>
    %85 = arith.mulf %84, %83 : vector<64x32xf32>
    %cst_41 = arith.constant 5.000000e-01 : f32
    %86 = vector.broadcast %cst_41 : f32 to vector<64x32xf32>
    %87 = arith.addf %86, %85 : vector<64x32xf32>
    %88 = math.log %87 : vector<64x32xf32>
    %89 = arith.addf %80, %88 : vector<64x32xf32>
    %cst_42 = arith.constant dense<0.000000e+00> : vector<64xf32>
    %90 = vector.multi_reduction <add>, %89, %cst_42 [1] : vector<64x32xf32> to vector<64xf32>
    %91 = vector.shape_cast %90 : vector<64xf32> to vector<64x1xf32>
    %cst_43 = arith.constant dense<0.000000e+00> : vector<1xf32>
    %92 = vector.multi_reduction <add>, %91, %cst_43 [0] : vector<64x1xf32> to vector<1xf32>
    %93 = vector.shape_cast %92 : vector<1xf32> to vector<1x1xf32>
    %94 = arith.addf %77, %93 : vector<1x1xf32>
    %95 = arith.mulf %33, %36 : vector<64x32xf32>
    %cst_44 = arith.constant dense<0.000000e+00> : vector<64xf32>
    %96 = vector.multi_reduction <add>, %95, %cst_44 [1] : vector<64x32xf32> to vector<64xf32>
    %97 = vector.shape_cast %96 : vector<64xf32> to vector<64x1xf32>
    %c0_45 = arith.constant 0 : index
    %c0_46 = arith.constant 0 : index
    %98 = vector.load %arg8[%c0_45, %c0_46] : memref<64x32xf32, #tpu.memory_space<vmem>>, vector<64x32xf32>
    %99 = arith.mulf %33, %98 : vector<64x32xf32>
    %cst_47 = arith.constant dense<0.000000e+00> : vector<64xf32>
    %100 = vector.multi_reduction <add>, %99, %cst_47 [1] : vector<64x32xf32> to vector<64xf32>
    %101 = vector.shape_cast %100 : vector<64xf32> to vector<64x1xf32>
    %cst_48 = arith.constant 0.000000e+00 : f32
    %102 = vector.broadcast %cst_48 : f32 to vector<64x1xf32>
    %103 = arith.subf %102, %97 : vector<64x1xf32>
    %cst_49 = arith.constant 0.000000e+00 : f32
    %104 = vector.broadcast %cst_49 : f32 to vector<64x1xf32>
    %105 = arith.maximumf %103, %104 : vector<64x1xf32>
    %106 = math.absf %103 : vector<64x1xf32>
    %cst_50 = arith.constant 0.000000e+00 : f32
    %107 = vector.broadcast %cst_50 : f32 to vector<64x1xf32>
    %108 = arith.subf %107, %106 : vector<64x1xf32>
    %109 = math.exp %108 : vector<64x1xf32>
    %cst_51 = arith.constant 1.000000e+00 : f32
    %110 = vector.broadcast %cst_51 : f32 to vector<64x1xf32>
    %111 = arith.addf %110, %109 : vector<64x1xf32>
    %112 = math.log %111 : vector<64x1xf32>
    %113 = arith.addf %105, %112 : vector<64x1xf32>
    %cst_52 = arith.constant 0.000000e+00 : f32
    %114 = vector.broadcast %cst_52 : f32 to vector<64x1xf32>
    %115 = arith.subf %114, %113 : vector<64x1xf32>
    %cst_53 = arith.constant 0.000000e+00 : f32
    %116 = vector.broadcast %cst_53 : f32 to vector<64x1xf32>
    %117 = arith.subf %116, %101 : vector<64x1xf32>
    %cst_54 = arith.constant 0.000000e+00 : f32
    %118 = vector.broadcast %cst_54 : f32 to vector<64x1xf32>
    %119 = arith.maximumf %117, %118 : vector<64x1xf32>
    %120 = math.absf %117 : vector<64x1xf32>
    %cst_55 = arith.constant 0.000000e+00 : f32
    %121 = vector.broadcast %cst_55 : f32 to vector<64x1xf32>
    %122 = arith.subf %121, %120 : vector<64x1xf32>
    %123 = math.exp %122 : vector<64x1xf32>
    %cst_56 = arith.constant 1.000000e+00 : f32
    %124 = vector.broadcast %cst_56 : f32 to vector<64x1xf32>
    %125 = arith.addf %124, %123 : vector<64x1xf32>
    %126 = math.log %125 : vector<64x1xf32>
    %127 = arith.addf %119, %126 : vector<64x1xf32>
    %cst_57 = arith.constant 0.000000e+00 : f32
    %128 = vector.broadcast %cst_57 : f32 to vector<64x1xf32>
    %129 = arith.subf %128, %127 : vector<64x1xf32>
    %130 = arith.addf %115, %129 : vector<64x1xf32>
    %cst_58 = arith.constant dense<0.000000e+00> : vector<1xf32>
    %131 = vector.multi_reduction <add>, %130, %cst_58 [0] : vector<64x1xf32> to vector<1xf32>
    %132 = vector.shape_cast %131 : vector<1xf32> to vector<1x1xf32>
    %133 = arith.subf %61, %94 : vector<1x1xf32>
    %134 = vector.broadcast %0 : f32 to vector<1x1xf32>
    %135 = arith.mulf %134, %133 : vector<1x1xf32>
    %136 = arith.subf %135, %132 : vector<1x1xf32>
    %cst_59 = arith.constant 1.562500e-02 : f32
    %137 = vector.broadcast %cst_59 : f32 to vector<1x1xf32>
    %138 = arith.mulf %136, %137 : vector<1x1xf32>
    %c0_60 = arith.constant 0 : index
    %c0_61 = arith.constant 0 : index
    %139 = vector.load %arg11[%c0_60, %c0_61] : memref<1x1xf32, #tpu.memory_space<vmem>>, vector<1x1xf32>
    tpu.vector_store %arg11[%c0_60, %c0_61], %138 {strides = array<i32>} : memref<1x1xf32, #tpu.memory_space<vmem>>, vector<1x1xf32>,
    return
  }
  func.func @transform_0(%arg0: i32) -> (i32, i32) {
    %c0_i32 = arith.constant 0 : i32
    %c0_i32_0 = arith.constant 0 : i32
    %c0_i32_1 = arith.constant 0 : i32
    return %c0_i32, %c0_i32_0 : i32, i32
  }
  func.func @transform_1(%arg0: i32) -> (i32, i32) {
    %c0_i32 = arith.constant 0 : i32
    %c0_i32_0 = arith.constant 0 : i32
    %c0_i32_1 = arith.constant 0 : i32
    return %c0_i32, %c0_i32_0 : i32, i32
  }
  func.func @transform_2(%arg0: i32) -> (i32, i32) {
    %c0_i32 = arith.constant 0 : i32
    %c0_i32_0 = arith.constant 0 : i32
    %c0_i32_1 = arith.constant 0 : i32
    return %c0_i32, %c0_i32_0 : i32, i32
  }
  func.func @transform_3(%arg0: i32) -> (i32, i32) {
    %c0_i32 = arith.constant 0 : i32
    %c0_i32_0 = arith.constant 0 : i32
    %c0_i32_1 = arith.constant 0 : i32
    return %c0_i32, %c0_i32_0 : i32, i32
  }
  func.func @transform_4(%arg0: i32) -> (i32, i32) {
    %c0_i32 = arith.constant 0 : i32
    %c0_i32_0 = arith.constant 0 : i32
    %c0_i32_1 = arith.constant 0 : i32
    return %c0_i32, %c0_i32_0 : i32, i32
  }
  func.func @transform_5(%arg0: i32) -> (i32, i32) {
    %c0_i32 = arith.constant 0 : i32
    %c0_i32_0 = arith.constant 0 : i32
    %c0_i32_1 = arith.constant 0 : i32
    return %c0_i32, %c0_i32_0 : i32, i32
  }
  func.func @transform_6(%arg0: i32) -> (i32, i32) {
    %c0_i32 = arith.constant 0 : i32
    %c0_i32_0 = arith.constant 0 : i32
    %c0_i32_1 = arith.constant 0 : i32
    return %c0_i32, %c0_i32_0 : i32, i32
  }
  func.func @transform_7(%arg0: i32) -> (i32, i32) {
    %c0_i32 = arith.constant 0 : i32
    %c0_i32_0 = arith.constant 0 : i32
    %c0_i32_1 = arith.constant 0 : i32
    return %c0_i32, %c0_i32_0 : i32, i32
  }
  func.func @transform_8(%arg0: i32) -> (i32, i32) {
    %c0_i32 = arith.constant 0 : i32
    %c0_i32_0 = arith.constant 0 : i32
    %c0_i32_1 = arith.constant 0 : i32
    return %c0_i32, %c0_i32_0 : i32, i32
  }
  func.func @transform_9(%arg0: i32) -> (i32, i32) {
    %c0_i32 = arith.constant 0 : i32
    %c0_i32_0 = arith.constant 0 : i32
    %c0_i32_1 = arith.constant 0 : i32
    return %c0_i32, %c0_i32_0 : i32, i32
  }
  func.func @transform_10(%arg0: i32) -> (i32, i32) {
    %c0_i32 = arith.constant 0 : i32
    %c0_i32_0 = arith.constant 0 : i32
    %c0_i32_1 = arith.constant 0 : i32
    return %c0_i32, %c0_i32_0 : i32, i32
  }
}

</mosaic_0001>

<bundles_post_ra>
// kernel: tpu_custom_call.1
= control target key start
LH: loop header
LB: loop body
LE: loop exit
PB: predicated region body
PF: predicated region fallthrough
CT: control target
= control target key end

     0   :  { %vm61_vm0 = vcmask 523264   ;;  %vm423_vm1 = vcmask 261120   ;;  %s2276_s0 = inlined_call_operand.<no memory space> [shape: f32[1,1], index: 0, kind: input, shape index: {}]   ;;  %s2277_s1 = inlined_call_operand.vmem [shape: f32[64,64], index: 1, kind: input, shape index: {}]   ;;  %s2278_s2 = inlined_call_operand.vmem [shape: f32[64,32], index: 2, kind: input, shape index: {}]   ;;  %s2279_s3 = inlined_call_operand.vmem [shape: f32[64,32], index: 3, kind: input, shape index: {}]   ;;  %s2280_s4 = inlined_call_operand.vmem [shape: f32[64,32], index: 4, kind: input, shape index: {}]   ;;  %s2281_s5 = inlined_call_operand.vmem [shape: f32[64,32], index: 5, kind: input, shape index: {}]   ;;  %s2282_s6 = inlined_call_operand.vmem [shape: f32[64,32], index: 6, kind: input, shape index: {}]   ;;  %s2283_s7 = inlined_call_operand.vmem [shape: f32[64,32], index: 7, kind: input, shape index: {}]   ;;  %s2284_s8 = inlined_call_operand.vmem [shape: f32[64,32], index: 8, kind: input, shape index: {}]   ;;  %s2285_s9 = inlined_call_operand.vmem [shape: f32[1,32], index: 9, kind: input, shape index: {}]   ;;  %s2286_s10 = inlined_call_operand.hbm [shape: f32[1,1], index: 10, kind: output, shape index: {}]  }
   0x1   :  { %v53_v0 = vld [vmem:[%s2284_s8 + $0x38] sm:$0xff]  ;;  %v52_v1 = vld [vmem:[%s2284_s8 + $0x30] sm:$0xff]  ;;  %v51_v2 = vld [vmem:[%s2284_s8 + $0x28] sm:$0xff] }
   0x2   :  { %1166 = vmatprep.subr.mxu0 %v53_v0  ;;  %1194 = vmatprep.subr.mxu1 %v53_v0  ;;  %v50_v3 = vld [vmem:[%s2284_s8 + $0x20] sm:$0xff]  ;;  %v1544_v4 = vld [vmem:[%s2278_s2 + $0x8] sm:$0xff]  ;;  %v49_v5 = vld [vmem:[%s2284_s8 + $0x18] sm:$0xff] }
   0x3   :  { %1167 = vmatpush3.msra.mxu0 %v53_v0  ;;  %1202 = vmatpush3.msra.mxu1 %v53_v0  ;;  %v232_v6 = vand.u32 2147483647, %v1544_v4  ;;  %v1553_v7 = vld [vmem:[%s2281_s5 + $0x8] sm:$0xff]  ;;  %v1559_v9 = vld [vmem:[%s2278_s2] sm:$0xff]  ;;  %v1564_v10 = vld [vmem:[%s2281_s5 + $0x10] sm:$0xff] }
   0x4   :  { %1168 = vmatprep.subr.mxu0 %v52_v1  ;;  %1195 = vmatprep.subr.mxu1 %v52_v1  ;;  %v304_v8 = vand.u32 2147483647, %v1553_v7  ;;  %v48_v11 = vld [vmem:[%s2284_s8 + $0x10] sm:$0xff]  ;;  %v1572_v13 = vld [vmem:[%s2281_s5] sm:$0xff]  ;;  %v1577_v14 = vld [vmem:[%s2279_s3 + $0x8] sm:$0xff] }
   0x5   :  { %1169 = vmatpush3.msra.mxu0 %v52_v1  ;;  %1203 = vmatpush3.msra.mxu1 %v52_v1  ;;  %v240_v12 = vsub.f32 0.0, %v232_v6  ;;  %v231_v16 = vand.u32 2147483647, %v1559_v9  ;;  %v47_v17 = vld [vmem:[%s2284_s8 + $0x8] sm:$0xff]  ;;  %v1586_v19 = vld [vmem:[%s2279_s3] sm:$0xff]  ;;  %v416_v25 = vmul.f32 %v1577_v14, %v1577_v14  ;;  %v1605_v31 = vld [vmem:[%s2278_s2 + $0x10] sm:$0xff] }
   0x6   :  { %1170 = vmatprep.subr.mxu0 %v51_v2  ;;  %1196 = vmatprep.subr.mxu1 %v51_v2  ;;  %v312_v15 = vsub.f32 0.0, %v304_v8  ;;  %v305_v20 = vand.u32 2147483647, %v1564_v10  ;;  %v303_v23 = vand.u32 2147483647, %v1572_v13  ;;  %v46_v24 = vld [vmem:[%s2284_s8] sm:$0xff]  ;;  %v415_v28 = vmul.f32 %v1586_v19, %v1586_v19 }
   0x7   :  { %1171 = vmatpush3.msra.mxu0 %v51_v2  ;;  %1204 = vmatpush3.msra.mxu1 %v51_v2  ;;  %v249_v18 = vmul.f32 1.442695, %v240_v12  ;;  %v239_v22 = vsub.f32 0.0, %v231_v16  ;;  %v1598_v27 = vld [vmem:[%s2282_s6 + $0x8] sm:$0xff]  ;;  %v38_v32 = vld [vmem:[%s2277_s1] sm:$0xff]  ;;  %v40_v39 = vld [vmem:[%s2277_s1 + $0x10] sm:$0xff] }
   0x8   :  { %1172 = vmatprep.subr.mxu0 %v50_v3  ;;  %1197 = vmatprep.subr.mxu1 %v50_v3  ;;  %v321_v21 = vmul.f32 1.442695, %v312_v15  ;;  %v313_v26 = vsub.f32 0.0, %v305_v20  ;;  %v311_v30 = vsub.f32 0.0, %v303_v23  ;;  %v42_v33 = vld [vmem:[%s2277_s1 + $0x20] sm:$0xff]  ;;  %v39_v36 = vld [vmem:[%s2277_s1 + $0x8] sm:$0xff]  ;;  %v462_v41 = vmul.f32 %v1598_v27, %v1598_v27 }
   0x9   :  { %1173 = vmatpush3.msra.mxu0 %v50_v3  ;;  %1205 = vmatpush3.msra.mxu1 %v50_v3  ;;  %1211 = vpow2.f32 %v249_v18  ;;  %v247_v29 = vmul.f32 1.442695, %v239_v22  ;;  %v1616_v35 = vld [vmem:[%s2282_s6] sm:$0xff]  ;;  %v43_v37 = vld [vmem:[%s2277_s1 + $0x28] sm:$0xff]  ;;  %v44_v40 = vld [vmem:[%s2277_s1 + $0x30] sm:$0xff]  ;;  %v427_v44 = vsel %vm423_vm1, %v416_v25, 0.0 }
   0xa   :  { %1174 = vmatprep.subr.mxu0 %v49_v5  ;;  %1198 = vmatprep.subr.mxu1 %v49_v5  ;;  %1213 = vpow2.f32 %v321_v21  ;;  %v323_v34 = vmul.f32 1.442695, %v313_v26  ;;  %v319_v38 = vmul.f32 1.442695, %v311_v30  ;;  %v233_v42 = vand.u32 2147483647, %v1605_v31 }
   0xb   :  { %1175 = vmatpush3.msra.mxu0 %v49_v5  ;;  %1206 = vmatpush3.msra.mxu1 %v49_v5  ;;  %1215 = vpow2.f32 %v247_v29  ;;  %v1636_v43 = vld [vmem:[%s2278_s2 + $0x18] sm:$0xff]  ;;  %v424_v45 = vsel %vm423_vm1, %v415_v28, 0.0  ;;  %v461_v46 = vmul.f32 %v1616_v35, %v1616_v35  ;;  %v1649_v47 = vld [vmem:[%s2282_s6 + $0x10] sm:$0xff] }
   0xc   :  { %1176 = vmatprep.subr.mxu0 %v48_v11  ;;  %1199 = vmatprep.subr.mxu1 %v48_v11  ;;  %1217 = vpow2.f32 %v323_v34  ;;  %v1654_v48 = vld [vmem:[%s2279_s3 + $0x10] sm:$0xff]  ;;  %v241_v49 = vsub.f32 0.0, %v233_v42  ;;  %v41_v50 = vld [vmem:[%s2277_s1 + $0x18] sm:$0xff]  ;;  %v234_v52 = vand.u32 2147483647, %v1636_v43 }
   0xd   :  { %1177 = vmatpush3.msra.mxu0 %v48_v11  ;;  %1207 = vmatpush3.msra.mxu1 %v48_v11  ;;  %1219 = vpow2.f32 %v319_v38  ;;  %v45_v51 = vld [vmem:[%s2277_s1 + $0x38] sm:$0xff] }
   0xe   :  { %1178 = vmatprep.subr.mxu0 %v47_v17  ;;  %1200 = vmatprep.subr.mxu1 %v47_v17 }
   0xf   :  { %1179 = vmatpush3.msra.mxu0 %v47_v17  ;;  %1208 = vmatpush3.msra.mxu1 %v47_v17 }
  0x10   :  { %1180 = vmatprep.subr.mxu0 %v46_v24  ;;  %1201 = vmatprep.subr.mxu1 %v46_v24 }
  0x11   :  { %1181 = vmatpush3.msra.mxu0 %v46_v24  ;;  %1209 = vmatpush3.msra.mxu1 %v46_v24 }
  0x12   :  { %1182 = vmatprep.mubr.msk.f32.mxu0 %vm61_vm0, %v38_v32  ;;  %1188 = vmatprep.mubr.msk.f32.mxu1 %vm61_vm0, %v42_v33 }
  0x13   :  { %1183 = vmatmul.mubr.msk.f32.vlgmr.msra.gmra.mxu0 %vm61_vm0, %v39_v36  ;;  %1189 = vmatmul.mubr.msk.f32.vlgmr.msra.gmra.mxu1 %vm61_vm0, %v43_v37 }
  0x14   :  { %1185 = vmatprep.mubr.msk.f32.mxu0 %vm61_vm0, %v40_v39  ;;  %1191 = vmatprep.mubr.msk.f32.mxu1 %vm61_vm0, %v44_v40 }
  0x15   :  { %16 = vsyncpa [#allocation4], 0  ;;  %428 = vadd.xlane.f32.xlu1 %v427_v44  ;;  %v472_v53 = vsel %vm423_vm1, %v462_v41, 0.0  ;;  %425 = vadd.xlane.f32.xlu0 %v424_v45  ;;  %v251_v54 = vmul.f32 1.442695, %v241_v49  ;;  %v463_v55 = vmul.f32 %v1649_v47, %v1649_v47  ;;  %v469_v56 = vsel %vm423_vm1, %v461_v46, 0.0 }
  0x16   :  { %v1672_v57 = vld [vmem:[%s2282_s6 + $0x18] sm:$0xff]  ;;  %v417_v58 = vmul.f32 %v1654_v48, %v1654_v48  ;;  %v242_v59 = vsub.f32 0.0, %v234_v52  ;;  %v1212_v63 = vpop.eup %1211  ;;  %v1690_v2 = vld [vmem:[%s2282_s6 + $0x20] sm:$0xff]  ;;  %v1706_v21 = vld [vmem:[%s2279_s3 + $0x28] sm:$0xff]  ;;  %v224_v42 = vmax.f32 %v1544_v4, 0.0  ;;  %v296_v45 = vmax.f32 %v1553_v7, 0.0 }
  0x17   :  { %1186 = vmatmul.mubr.msk.f32.gmra.mxu0 %vm61_vm0, %v41_v50  ;;  %1192 = vmatmul.mubr.msk.f32.gmra.mxu1 %vm61_vm0, %v45_v51  ;;  %1221 = vpow2.f32 %v251_v54  ;;  %v1681_v60 = vld [vmem:[%s2279_s3 + $0x18] sm:$0xff]  ;;  %v464_v62 = vmul.f32 %v1672_v57, %v1672_v57  ;;  %v475_v0 = vsel %vm423_vm1, %v463_v55, 0.0  ;;  %v1214_v5 = vpop.eup %1213  ;;  %v264_v6 = vadd.f32 1.0, %v1212_v63  ;;  %v1697_v8 = vld [vmem:[%s2279_s3 + $0x20] sm:$0xff]  ;;  %v1713_v25 = vld [vmem:[%s2282_s6 + $0x28] sm:$0xff]  ;;  %s1473_s27 = smov [#allocation3]  }
  0x18   :  { %v253_v61 = vmul.f32 1.442695, %v242_v59  ;;  %v430_v1 = vsel %vm423_vm1, %v417_v58, 0.0  ;;  %v418_v3 = vmul.f32 %v1681_v60, %v1681_v60  ;;  %v336_v11 = vadd.f32 1.0, %v1214_v5  ;;  %v1216_v12 = vpop.eup %1215  ;;  %v1724_v33 = vld [vmem:[%s2279_s3 + $0x30] sm:$0xff]  ;;  %v392_v63 = vld [vmem:[%s2280_s4 + $0x8] sm:$0xff] }
  0x19   :  { %473 = vadd.xlane.f32.xlu1 %v472_v53  ;;  %470 = vadd.xlane.f32.xlu0 %v469_v56  ;;  %v478_v15 = vsel %vm423_vm1, %v464_v62, 0.0  ;;  %v465_v16 = vmul.f32 %v1690_v2, %v1690_v2  ;;  %v1218_v17 = vpop.eup %1217  ;;  %v263_v18 = vadd.f32 1.0, %v1216_v12  ;;  %v419_v22 = vmul.f32 %v1697_v8, %v1697_v8  ;;  %v393_v12 = vld [vmem:[%s2280_s4 + $0x10] sm:$0xff]  ;;  %s1133_s28 = sshll.u32 %s1473_s27, 4  ;;  %s1134_s28 = int_to_ptr.vmem [resolvable:$true] %s1133_s28 }
  0x1a   :  { %1223 = vpow2.f32 %v253_v61  ;;  %v433_v20 = vsel %vm423_vm1, %v418_v3, 0.0  ;;  %v1220_v23 = vpop.eup %1219  ;;  %v337_v24 = vadd.f32 1.0, %v1218_v17  ;;  %v420_v28 = vmul.f32 %v1706_v21, %v1706_v21  ;;  %s1451_s29 = scalar_lea.vmem %s1134_s28, 16  ;;  %s1455_s30 = scalar_lea.vmem %s1134_s28, 32 }
  0x1b   :  { %1225 = vlog2.f32 %v264_v6  ;;  %v335_v26 = vadd.f32 1.0, %v1220_v23  ;;  %v481_v29 = vsel %vm423_vm1, %v465_v16, 0.0  ;;  %v436_v30 = vsel %vm423_vm1, %v419_v22, 0.0  ;;  %p1452_p0 = scmp.ne.s32.totalorder %s1134_s28, %s1451_s29  ;;  %p1456_p1 = scmp.lt.s32.totalorder %s1134_s28, %s1134_s28 }
  0x1c   :  { %1227 = vlog2.f32 %v336_v11  ;;  %v466_v32 = vmul.f32 %v1713_v25, %v1713_v25  ;;  %v439_v37 = vsel %vm423_vm1, %v420_v28, 0.0  ;;  %v421_v38 = vmul.f32 %v1724_v33, %v1724_v33  ;;  %p1457_p2 = scmp.lt.s32.totalorder %s1455_s30, %s1451_s29 }
  0x1d   :  { %476 = vadd.xlane.f32.xlu1 %v475_v0  ;;  %431 = vadd.xlane.f32.xlu0 %v430_v1  ;;  %1229 = vlog2.f32 %v263_v18  ;;  %v223_v52 = vmax.f32 %v1559_v9, 0.0  ;;  %v297_v55 = vmax.f32 %v1564_v10, 0.0  ;;  %v295_v59 = vmax.f32 %v1572_v13, 0.0 }
  0x1e   :  { %1231 = vlog2.f32 %v337_v24  ;;  %v484_v39 = vsel %vm423_vm1, %v466_v32, 0.0  ;;  %v442_v46 = vsel %vm423_vm1, %v421_v38, 0.0  ;;  %v225_v6 = vmax.f32 %v1605_v31, 0.0  ;;  %p1458_p3 = por %p1457_p2, %p1456_p1 }
  0x1f   :  { %1233 = vlog2.f32 %v335_v26  ;;  %v226_v16 = vmax.f32 %v1636_v43, 0.0  ;;  %vm1125_vm2 = vcmask 0  }
  0x20   :  { %p1459_p4 = pnand %p1458_p3, %p1452_p0 }
  0x21   :  { %479 = vadd.xlane.f32.xlu1 %v478_v15  ;;  %434 = vadd.xlane.f32.xlu0 %v433_v20 }
  0x24   :  { %v1222_v34 = vpop.eup %1221 }
  0x25   :  { %v265_v36 = vadd.f32 1.0, %v1222_v34  ;;  %482 = vadd.xlane.f32.xlu1 %v481_v29  ;;  %437 = vadd.xlane.f32.xlu0 %v436_v30 }
  0x27   :  { %v1224_v40 = vpop.eup %1223  ;;  %1235 = vlog2.f32 %v265_v36 }
  0x28   :  { %v266_v41 = vadd.f32 1.0, %v1224_v40  ;;  %v1226_v44 = vpop.eup %1225 }
  0x29   :  { %440 = vadd.xlane.f32.xlu1 %v439_v37  ;;  %485 = vadd.xlane.f32.xlu0 %v484_v39  ;;  %v1228_v49 = vpop.eup %1227  ;;  %v274_v50 = vmul.f32 0.6931472, %v1226_v44 }
  0x2a   :  { %1237 = vlog2.f32 %v266_v41  ;;  %v346_v51 = vmul.f32 0.6931472, %v1228_v49  ;;  %v1230_v53 = vpop.eup %1229 }
  0x2b   :  { %v288_v54 = vadd.f32 %v274_v50, %v224_v42  ;;  %v1232_v56 = vpop.eup %1231  ;;  %v272_v58 = vmul.f32 0.6931472, %v1230_v53 }
  0x2c   :  { %v360_v4 = vadd.f32 %v346_v51, %v296_v45  ;;  %v1234_v61 = vpop.eup %1233  ;;  %v348_v62 = vmul.f32 0.6931472, %v1232_v56 }
  0x2d   :  { %443 = vadd.xlane.f32.xlu1 %v442_v46  ;;  %v1737_v7 = vmul.f32 %v288_v54, %v1577_v14  ;;  %v287_v0 = vadd.f32 %v272_v58, %v223_v52  ;;  %v344_v1 = vmul.f32 0.6931472, %v1234_v61  ;;  %1239 = vlog2.f32 %v288_v54 }
  0x2e   :  { %v400_v9 = vmul.f32 %v360_v4, %v1598_v27  ;;  %v361_v10 = vadd.f32 %v348_v62, %v297_v55  ;;  %v391_v27 = vld [vmem:[%s2280_s4] sm:$0xff] }
  0x2f   :  { %v1744_v3 = vmul.f32 %v287_v0, %v1586_v19  ;;  %v359_v5 = vadd.f32 %v344_v1, %v295_v59  ;;  %1241 = vlog2.f32 %v287_v0 }
  0x30   :  { %v1746_v13 = vadd.f32 %v400_v9, %v392_v63  ;;  %v401_v14 = vmul.f32 %v361_v10, %v1649_v47 }
  0x31   :  { %v399_v15 = vmul.f32 %v359_v5, %v1616_v35 }
  0x32   :  { %v1758_v18 = vadd.f32 %v401_v14, %v393_v12  ;;  %v734_v20 = vmul.f32 %v1746_v13, %v1746_v13 }
  0x33   :  { %v1760_v47 = vadd.f32 %v399_v15, %v391_v27 }
  0x34   :  { %v1236_v11 = vpop.eup %1235  ;;  %v750_v24 = vmul.f32 -12.0, %v734_v20  ;;  %v735_v43 = vmul.f32 %v1758_v18, %v1758_v18 }
  0x35   :  { %v276_v19 = vmul.f32 0.6931472, %v1236_v11  ;;  %v733_v28 = vmul.f32 %v1760_v47, %v1760_v47 }
  0x36   :  { %v759_v35 = vmul.f32 1.442695, %v750_v24  ;;  %v751_v34 = vmul.f32 -12.0, %v735_v43 }
  0x37   :  { %v1238_v17 = vpop.eup %1237  ;;  %v289_v31 = vadd.f32 %v276_v19, %v225_v6  ;;  %v749_v32 = vmul.f32 -12.0, %v733_v28  ;;  %v742_v6 = vmul.f32 -0.5, %v734_v20  ;;  %v741_v27 = vmul.f32 -0.5, %v733_v28  ;;  %v210_v20 = vld [vmem:[%s2281_s5 + $0x18] sm:$0xff] }
  0x38   :  { %v278_v22 = vmul.f32 0.6931472, %v1238_v17  ;;  %1243 = vpow2.f32 %v759_v35  ;;  %v743_v19 = vmul.f32 -0.5, %v735_v43  ;;  %v306_v28 = vand.u32 2147483647, %v210_v20 }
  0x39   :  { %v1765_v23 = vmul.f32 %v289_v31, %v1654_v48  ;;  %v757_v37 = vmul.f32 1.442695, %v749_v32  ;;  %v761_v48 = vmul.f32 1.442695, %v751_v34  ;;  %v1790_v34 = vld [vmem:[%s2281_s5 + $0x20] sm:$0xff] }
  0x3a   :  { %v290_v26 = vadd.f32 %v278_v22, %v226_v16  ;;  %v1240_v30 = vpop.eup %1239  ;;  %v314_v43 = vsub.f32 0.0, %v306_v28 }
  0x3b   :  { %v511_v36 = vmul.f32 0.6931472, %v1240_v30  ;;  %1245 = vpow2.f32 %v757_v37  ;;  %v1796_v37 = vld [vmem:[%s2281_s5 + $0x28] sm:$0xff] }
  0x3c   :  { %v1772_v29 = vmul.f32 %v290_v26, %v1681_v60  ;;  %v1242_v39 = vpop.eup %1241  ;;  %1247 = vpow2.f32 %v761_v48  ;;  %v325_v32 = vmul.f32 1.442695, %v314_v43 }
  0x3d   :  { %v527_v38 = vsel %vm423_vm1, %v511_v36, 0.0  ;;  %v509_v40 = vmul.f32 0.6931472, %v1242_v39  ;;  %1249 = vlog2.f32 %v359_v5  ;;  %v307_v36 = vand.u32 2147483647, %v1790_v34 }
  0x3e   :  { %528 = vadd.xlane.f32.xlu1 %v527_v38  ;;  %1251 = vlog2.f32 %v289_v31  ;;  %v308_v39 = vand.u32 2147483647, %v1796_v37 }
  0x3f   :  { %v524_v41 = vsel %vm423_vm1, %v509_v40, 0.0  ;;  %1253 = vlog2.f32 %v290_v26  ;;  %v315_v38 = vsub.f32 0.0, %v307_v36 }
  0x40   :  { %525 = vadd.xlane.f32.xlu0 %v524_v41  ;;  %1255 = vlog2.f32 %v360_v4  ;;  %v1802_v41 = vld [vmem:[%s2278_s2 + $0x28] sm:$0xff] }
  0x41   :  { %1257 = vlog2.f32 %v361_v10 }
  0x45   :  { %v1244_v60 = vpop.eup %1243 }
  0x46   :  { %v774_v42 = vmul.f32 0.5, %v1244_v60  ;;  %v327_v60 = vmul.f32 1.442695, %v315_v38 }
  0x48   :  { %v782_v44 = vadd.f32 0.5, %v774_v42  ;;  %v1246_v45 = vpop.eup %1245  ;;  %v236_v42 = vand.u32 2147483647, %v1802_v41 }
  0x49   :  { %v1248_v46 = vpop.eup %1247  ;;  %v773_v49 = vmul.f32 0.5, %v1246_v45  ;;  %v316_v45 = vsub.f32 0.0, %v308_v39  ;;  %v394_v39 = vld [vmem:[%s2280_s4 + $0x18] sm:$0xff] }
  0x4a   :  { %1259 = vlog2.f32 %v782_v44  ;;  %v775_v50 = vmul.f32 0.5, %v1248_v46  ;;  %v1250_v52 = vpop.eup %1249  ;;  %v1808_v44 = vld [vmem:[%s2278_s2 + $0x20] sm:$0xff]  ;;  %v1813_v46 = vld [vmem:[%s2281_s5 + $0x30] sm:$0xff] }
  0x4b   :  { %v781_v51 = vadd.f32 0.5, %v773_v49  ;;  %v1252_v54 = vpop.eup %1251  ;;  %v563_v55 = vmul.f32 0.6931472, %v1250_v52  ;;  %v235_v49 = vand.u32 2147483647, %v1808_v44 }
  0x4c   :  { %v783_v53 = vadd.f32 0.5, %v775_v50  ;;  %v513_v56 = vmul.f32 0.6931472, %v1252_v54  ;;  %v1254_v59 = vpop.eup %1253  ;;  %v244_v50 = vsub.f32 0.0, %v236_v42  ;;  %v329_v52 = vmul.f32 1.442695, %v316_v45 }
  0x4d   :  { %1261 = vlog2.f32 %v781_v51  ;;  %v578_v58 = vsel %vm423_vm1, %v563_v55, 0.0  ;;  %v1256_v61 = vpop.eup %1255  ;;  %v515_v62 = vmul.f32 0.6931472, %v1254_v59  ;;  %v1819_v51 = vld [vmem:[%s2278_s2 + $0x30] sm:$0xff]  ;;  %v309_v54 = vand.u32 2147483647, %v1813_v46 }
  0x4e   :  { %1263 = vlog2.f32 %v783_v53  ;;  %579 = vadd.xlane.f32.xlu1 %v578_v58  ;;  %v530_v4 = vsel %vm423_vm1, %v513_v56, 0.0  ;;  %v565_v63 = vmul.f32 0.6931472, %v1256_v61  ;;  %v1258_v0 = vpop.eup %1257  ;;  %v1824_v53 = vld [vmem:[%s2281_s5 + $0x38] sm:$0xff]  ;;  %v243_v55 = vsub.f32 0.0, %v235_v49 }
  0x4f   :  { %531 = vadd.xlane.f32.xlu0 %v530_v4  ;;  %v533_v9 = vsel %vm423_vm1, %v515_v62, 0.0  ;;  %v567_v10 = vmul.f32 0.6931472, %v1258_v0  ;;  %1265 = vpow2.f32 %v325_v32  ;;  %v237_v56 = vand.u32 2147483647, %v1819_v51  ;;  %v1832_v4 = vld [vmem:[%s2278_s2 + $0x38] sm:$0xff] }
  0x50   :  { %v581_v1 = vsel %vm423_vm1, %v565_v63, 0.0  ;;  %v257_v58 = vmul.f32 1.442695, %v244_v50  ;;  %v310_v59 = vand.u32 2147483647, %v1824_v53  ;;  %v317_v61 = vsub.f32 0.0, %v309_v54 }
  0x51   :  { %v584_v14 = vsel %vm423_vm1, %v567_v10, 0.0  ;;  %v255_v62 = vmul.f32 1.442695, %v243_v55  ;;  %v245_v63 = vsub.f32 0.0, %v237_v56 }
  0x52   :  { %534 = vadd.xlane.f32.xlu1 %v533_v9  ;;  %v238_v9 = vand.u32 2147483647, %v1832_v4  ;;  %v318_v0 = vsub.f32 0.0, %v310_v59 }
  0x53   :  { %582 = vadd.xlane.f32.xlu0 %v581_v1  ;;  %v331_v1 = vmul.f32 1.442695, %v317_v61 }
  0x57   :  { %v1260_v5 = vpop.eup %1259  ;;  %585 = vadd.xlane.f32.xlu0 %v584_v14  ;;  %v259_v14 = vmul.f32 1.442695, %v245_v63 }
  0x58   :  { %v792_v11 = vmul.f32 0.6931472, %v1260_v5 }
  0x5a   :  { %v806_v12 = vadd.f32 %v792_v11, %v742_v6  ;;  %v1262_v15 = vpop.eup %1261  ;;  %v246_v11 = vsub.f32 0.0, %v238_v9 }
  0x5b   :  { %v1264_v16 = vpop.eup %1263  ;;  %v790_v31 = vmul.f32 0.6931472, %v1262_v15 }
  0x5c   :  { %v816_v17 = vsel %vm423_vm1, %v806_v12, 0.0  ;;  %v794_v22 = vmul.f32 0.6931472, %v1264_v16  ;;  %v1266_v48 = vpop.eup %1265  ;;  %v333_v12 = vmul.f32 1.442695, %v318_v0 }
  0x5d   :  { %817 = vadd.xlane.f32.xlu0 %v816_v17  ;;  %v805_v24 = vadd.f32 %v790_v31, %v741_v27  ;;  %v338_v40 = vadd.f32 1.0, %v1266_v48  ;;  %v298_v27 = vmax.f32 %v210_v20, 0.0 }
  0x5e   :  { %v807_v26 = vadd.f32 %v794_v22, %v743_v19  ;;  %v261_v22 = vmul.f32 1.442695, %v246_v11 }
  0x5f   :  { %v813_v35 = vsel %vm423_vm1, %v805_v24, 0.0  ;;  %1267 = vlog2.f32 %v338_v40 }
  0x60   :  { %814 = vadd.xlane.f32.xlu1 %v813_v35  ;;  %v819_v30 = vsel %vm423_vm1, %v807_v26, 0.0  ;;  %1269 = vpow2.f32 %v327_v60 }
  0x61   :  { %820 = vadd.xlane.f32.xlu0 %v819_v30  ;;  %1271 = vpow2.f32 %v329_v52 }
  0x62   :  { %1273 = vpow2.f32 %v257_v58 }
  0x63   :  { %1275 = vpow2.f32 %v255_v62 }
  0x64   :  { %1277 = vpow2.f32 %v331_v1 }
  0x65   :  { %1279 = vpow2.f32 %v259_v14 }
  0x66   :  { %1281 = vpow2.f32 %v333_v12 }
  0x6c   :  { %v1268_v5 = vpop.eup %1267 }
  0x6d   :  { %v1270_v6 = vpop.eup %1269  ;;  %v350_v15 = vmul.f32 0.6931472, %v1268_v5 }
  0x6e   :  { %v339_v31 = vadd.f32 1.0, %v1270_v6  ;;  %v1272_v24 = vpop.eup %1271 }
  0x6f   :  { %v1835_v26 = vadd.f32 %v350_v15, %v298_v27  ;;  %v340_v43 = vadd.f32 1.0, %v1272_v24  ;;  %v1274_v20 = vpop.eup %1273  ;;  %v1141_v24 = vld [vmem:[%s2285_s9] ss:$0 sm:$0xff] }
  0x70   :  { %1283 = vlog2.f32 %v339_v31  ;;  %v1276_v42 = vpop.eup %1275  ;;  %v268_v45 = vadd.f32 1.0, %v1274_v20  ;;  %v300_v20 = vmax.f32 %v1796_v37, 0.0 }
  0x71   :  { %1285 = vpow2.f32 %v261_v22  ;;  %v402_v36 = vmul.f32 %v1835_v26, %v1672_v57  ;;  %v1278_v54 = vpop.eup %1277  ;;  %v267_v58 = vadd.f32 1.0, %v1276_v42 }
  0x72   :  { %1287 = vlog2.f32 %v340_v43  ;;  %v1280_v57 = vpop.eup %1279  ;;  %v341_v61 = vadd.f32 1.0, %v1278_v54  ;;  %v228_v54 = vmax.f32 %v1802_v41, 0.0  ;;  %v227_v41 = vmax.f32 %v1808_v44, 0.0 }
  0x73   :  { %v1842_v49 = vadd.f32 %v402_v36, %v394_v39  ;;  %1289 = vlog2.f32 %v268_v45  ;;  %v1282_v59 = vpop.eup %1281  ;;  %v269_v1 = vadd.f32 1.0, %v1280_v57 }
  0x74   :  { %1291 = vlog2.f32 %v267_v58  ;;  %v342_v5 = vadd.f32 1.0, %v1282_v59 }
  0x75   :  { %v1846_v62 = vmul.f32 %v1842_v49, %v1842_v49  ;;  %1293 = vlog2.f32 %v341_v61  ;;  %v395_v61 = vld [vmem:[%s2280_s4 + $0x20] sm:$0xff] }
  0x76   :  { %1295 = vlog2.f32 %v269_v1 }
  0x77   :  { %v752_v11 = vmul.f32 -12.0, %v1846_v62  ;;  %1297 = vlog2.f32 %v342_v5 }
  0x9e   :  { %v429_v10 = vpop.xlane.xlu1 %428  ;;  %v426_v16 = vpop.xlane.xlu0 %425 }
  0x9f   :  { %v448_v17 = vadd.f32 %v429_v10, %v426_v16  ;;  %v1284_v10 = vpop.eup %1283  ;;  %v299_v16 = vmax.f32 %v1790_v34, 0.0 }
  0xa0   :  { %v1286_v6 = vpop.eup %1285 }
  0xa1   :  { %v270_v31 = vadd.f32 1.0, %v1286_v6  ;;  %v1288_v22 = vpop.eup %1287 }
  0xa2   :  { %v474_v19 = vpop.xlane.xlu1 %473  ;;  %v471_v30 = vpop.xlane.xlu0 %470  ;;  %v354_v34 = vmul.f32 0.6931472, %v1288_v22  ;;  %v229_v22 = vmax.f32 %v1819_v51, 0.0  ;;  %v1893_v51 = vld [vmem:[%s2282_s6 + $0x30] sm:$0xff] }
  0xa3   :  { %v493_v28 = vadd.f32 %v474_v19, %v471_v30  ;;  %1299 = vlog2.f32 %v270_v31 }
  0xa4   :  { %v1863_v58 = vadd.f32 %v354_v34, %v300_v20  ;;  %v302_v20 = vmax.f32 %v1824_v53, 0.0 }
  0xa6   :  { %v477_v35 = vpop.xlane.xlu1 %476  ;;  %v432_v38 = vpop.xlane.xlu0 %431 }
  0xa7   :  { %v494_v32 = vadd.f32 %v493_v28, %v477_v35  ;;  %v449_v60 = vadd.f32 %v448_v17, %v432_v38  ;;  %v352_v17 = vmul.f32 0.6931472, %v1284_v10  ;;  %v763_v35 = vmul.f32 1.442695, %v752_v11 }
  0xa9   :  { %1301 = vpow2.f32 %v763_v35 }
  0xaa   :  { %v480_v48 = vpop.xlane.xlu1 %479  ;;  %v435_v52 = vpop.xlane.xlu0 %434 }
  0xab   :  { %v495_v40 = vadd.f32 %v494_v32, %v480_v48  ;;  %v450_v56 = vadd.f32 %v449_v60, %v435_v52  ;;  %v1857_v32 = vadd.f32 %v352_v17, %v299_v16  ;;  %v301_v16 = vmax.f32 %v1813_v46, 0.0 }
  0xad   :  { %v403_v52 = vmul.f32 %v1857_v32, %v1690_v2 }
  0xae   :  { %v483_v50 = vpop.xlane.xlu1 %482  ;;  %v438_v9 = vpop.xlane.xlu0 %437 }
  0xaf   :  { %v496_v55 = vadd.f32 %v495_v40, %v483_v50  ;;  %v451_v0 = vadd.f32 %v450_v56, %v438_v9  ;;  %v1290_v40 = vpop.eup %1289  ;;  %v1869_v1 = vadd.f32 %v403_v52, %v395_v61 }
  0xb0   :  { %v282_v56 = vmul.f32 0.6931472, %v1290_v40 }
  0xb1   :  { %v1881_v17 = vmul.f32 %v1869_v1, %v1869_v1 }
  0xb2   :  { %v441_v63 = vpop.xlane.xlu1 %440  ;;  %v486_v27 = vpop.xlane.xlu0 %485  ;;  %v1871_v5 = vadd.f32 %v282_v56, %v228_v54 }
  0xb3   :  { %v452_v14 = vadd.f32 %v451_v0, %v441_v63  ;;  %v1851_v19 = vadd.f32 %v496_v55, %v486_v27  ;;  %v1292_v55 = vpop.eup %1291  ;;  %v396_v27 = vld [vmem:[%s2280_s4 + $0x28] sm:$0xff] }
  0xb4   :  { %v1294_v9 = vpop.eup %1293  ;;  %v280_v0 = vmul.f32 0.6931472, %v1292_v55  ;;  %v380_v46 = vmul.f32 %v1871_v5, %v1706_v21  ;;  %v884_v21 = vld [vmem:[%s2283_s7 + $0x8] sm:$0xff] }
  0xb5   :  { %v1296_v10 = vpop.eup %1295  ;;  %v356_v44 = vmul.f32 0.6931472, %v1294_v9 }
  0xb6   :  { %v444_v12 = vpop.xlane.xlu1 %443  ;;  %v291_v31 = vadd.f32 %v280_v0, %v227_v41  ;;  %v284_v35 = vmul.f32 0.6931472, %v1296_v10  ;;  %v1920_v0 = vld [vmem:[%s2282_s6 + $0x38] sm:$0xff]  ;;  %v397_v10 = vld [vmem:[%s2280_s4 + $0x30] sm:$0xff] }
  0xb7   :  { %v1849_v15 = vadd.f32 %v452_v14, %v444_v12  ;;  %v404_v14 = vmul.f32 %v1863_v58, %v1713_v25  ;;  %v1298_v12 = vpop.eup %1297 }
  0xb8   :  { %v1300_v34 = vpop.eup %1299 }
  0xb9   :  { %v286_v55 = vmul.f32 0.6931472, %v1300_v34 }
  0xc7   :  { %v529_v30 = vpop.xlane.xlu1 %528 }
  0xc9   :  { %v526_v28 = vpop.xlane.xlu0 %525 }
  0xca   :  { %v548_v43 = vadd.f32 %v529_v30, %v526_v28  ;;  %v412_v28 = vadd.f32 %v404_v14, %v396_v27 }
  0xd3   :  { %v1184_v36 = vpop.f32.mrf.mxu0  ;;  %v1190_v48 = vpop.f32.mrf.mxu1 }
  0xd4   :  { %v158_v38 = vadd.f32 %v1184_v36, %v1141_v24  ;;  %v178_v39 = vadd.f32 %v1190_v48, %v1141_v24  ;;  %v358_v36 = vmul.f32 0.6931472, %v1298_v12 }
  0xd5   :  { %v152_v60 = vpop.f32.mrf.mxu0  ;;  %v172_v42 = vpop.f32.mrf.mxu1 }
  0xd6   :  { %1303 = vtanh.f32 %v158_v38  ;;  %v153_v45 = vadd.f32 %v1141_v24, %v152_v60  ;;  %v173_v50 = vadd.f32 %v1141_v24, %v172_v42  ;;  %v1887_v38 = vadd.f32 %v356_v44, %v301_v16  ;;  %v1302_v60 = vpop.eup %1301 }
  0xd7   :  { %1305 = vtanh.f32 %v178_v39  ;;  %v1187_v37 = vpop.f32.mrf.mxu0  ;;  %v1193_v59 = vpop.f32.mrf.mxu1  ;;  %v753_v39 = vmul.f32 -12.0, %v1881_v17  ;;  %v379_v42 = vmul.f32 %v291_v31, %v1697_v8  ;;  %v1908_v56 = vadd.f32 %v358_v36, %v302_v20 }
  0xd8   :  { %1307 = vtanh.f32 %v153_v45  ;;  %v168_v57 = vadd.f32 %v1187_v37, %v1141_v24  ;;  %v188_v6 = vadd.f32 %v1193_v59, %v1141_v24  ;;  %v580_v30 = vpop.xlane.xlu1 %579  ;;  %v532_v48 = vpop.xlane.xlu0 %531  ;;  %v1898_v45 = vadd.f32 %v284_v35, %v229_v22  ;;  %v888_v37 = vld [vmem:[%s2283_s7 + $0x28] sm:$0xff]  ;;  %v883_v35 = vld [vmem:[%s2283_s7] sm:$0xff] }
  0xd9   :  { %1309 = vtanh.f32 %v173_v50  ;;  %v162_v63 = vpop.f32.mrf.mxu0  ;;  %v182_v11 = vpop.f32.mrf.mxu1  ;;  %v549_v40 = vadd.f32 %v548_v43, %v532_v48  ;;  %v230_v43 = vmax.f32 %v1832_v4, 0.0  ;;  %v765_v4 = vmul.f32 1.442695, %v753_v39 }
  0xda   :  { %1311 = vtanh.f32 %v168_v57  ;;  %v163_v2 = vadd.f32 %v1141_v24, %v162_v63  ;;  %v183_v25 = vadd.f32 %v1141_v24, %v182_v11  ;;  %v1895_v24 = vmul.f32 %v412_v28, %v412_v28 }
  0xdb   :  { %v405_v63 = vmul.f32 %v1887_v38, %v1893_v51  ;;  %v776_v14 = vmul.f32 0.5, %v1302_v60  ;;  %v398_v60 = vld [vmem:[%s2280_s4 + $0x38] sm:$0xff] }
  0xdc   :  { %1313 = vtanh.f32 %v163_v2  ;;  %v535_v50 = vpop.xlane.xlu1 %534  ;;  %v583_v57 = vpop.xlane.xlu0 %582 }
  0xdd   :  { %1315 = vtanh.f32 %v188_v6  ;;  %v1910_v8 = vadd.f32 %v549_v40, %v535_v50  ;;  %v1914_v9 = vadd.f32 %v583_v57, %v580_v30  ;;  %v754_v6 = vmul.f32 -12.0, %v1895_v24 }
  0xde   :  { %1317 = vtanh.f32 %v183_v25  ;;  %v1932_v25 = vadd.f32 %v286_v55, %v230_v43  ;;  %v1942_v20 = vadd.f32 %v405_v63, %v397_v10  ;;  %v381_v55 = vmul.f32 %v1898_v45, %v1724_v33 }
  0xdf   :  { %1319 = vlog2.f32 %v291_v31 }
  0xe0   :  { %1321 = vpow2.f32 %v765_v4 }
  0xe1   :  { %1323 = vlog2.f32 %v1835_v26 }
  0xe3   :  { %v1304_v53 = vpop.eup %1303 }
  0xe4   :  { %v1306_v52 = vpop.eup %1305  ;;  %v384_v54 = vadd.f32 %v1304_v53, %v1737_v7  ;;  %v767_v53 = vmul.f32 1.442695, %v754_v6 }
  0xe5   :  { %v1308_v59 = vpop.eup %1307  ;;  %v388_v61 = vadd.f32 %v1306_v52, %v380_v46  ;;  %v784_v46 = vadd.f32 0.5, %v776_v14 }
  0xe6   :  { %v1310_v2 = vpop.eup %1309  ;;  %v892_v7 = vmul.f32 %v884_v21, %v384_v54  ;;  %v852_v41 = vmul.f32 %v1746_v13, %v384_v54  ;;  %v383_v16 = vadd.f32 %v1308_v59, %v1744_v3  ;;  %v1938_v3 = vld [vmem:[%s2279_s3 + $0x38] sm:$0xff] }
  0xe7   :  { %v1312_v11 = vpop.eup %1311  ;;  %v896_v12 = vmul.f32 %v888_v37, %v388_v61  ;;  %v856_v27 = vmul.f32 %v412_v28, %v388_v61  ;;  %v387_v44 = vadd.f32 %v1310_v2, %v379_v42  ;;  %v406_v28 = vmul.f32 %v1908_v56, %v1920_v0 }
  0xe8   :  { %v902_v13 = vsel %vm423_vm1, %v892_v7, 0.0  ;;  %v862_v22 = vsel %vm423_vm1, %v852_v41, 0.0  ;;  %v386_v34 = vadd.f32 %v1312_v11, %v1772_v29  ;;  %v891_v39 = vmul.f32 %v883_v35, %v383_v16  ;;  %v890_v7 = vld [vmem:[%s2283_s7 + $0x38] sm:$0xff] }
  0xe9   :  { %903 = vadd.xlane.f32.xlu1 %v902_v13  ;;  %863 = vadd.xlane.f32.xlu0 %v862_v22  ;;  %v855_v30 = vmul.f32 %v1869_v1, %v387_v44  ;;  %v1314_v36 = vpop.eup %1313  ;;  %v914_v48 = vsel %vm423_vm1, %v896_v12, 0.0  ;;  %v874_v31 = vsel %vm423_vm1, %v856_v27, 0.0  ;;  %v887_v1 = vld [vmem:[%s2283_s7 + $0x20] sm:$0xff]  ;;  %v851_v40 = vmul.f32 %v1760_v47, %v383_v16 }
  0xea   :  { %v1956_v42 = vmul.f32 %v1942_v20, %v1942_v20  ;;  %v854_v21 = vmul.f32 %v1842_v49, %v386_v34  ;;  %v382_v43 = vmul.f32 %v1932_v25, %v1938_v3  ;;  %v1961_v50 = vmul.f32 %v388_v61, %v388_v61  ;;  %v1316_v29 = vpop.eup %1315  ;;  %v886_v61 = vld [vmem:[%s2283_s7 + $0x18] sm:$0xff] }
  0xeb   :  { %v895_v47 = vmul.f32 %v887_v1, %v387_v44  ;;  %v1964_v52 = vadd.f32 %v1314_v36, %v1765_v23  ;;  %v1967_v37 = vmul.f32 %v384_v54, %v384_v54  ;;  %v414_v49 = vadd.f32 %v406_v28, %v398_v60  ;;  %v1318_v63 = vpop.eup %1317 }
  0xec   :  { %1325 = vlog2.f32 %v784_v46  ;;  %v899_v57 = vsel %vm423_vm1, %v891_v39, 0.0  ;;  %v859_v59 = vsel %vm423_vm1, %v851_v40, 0.0  ;;  %v755_v23 = vmul.f32 -12.0, %v1956_v42 }
  0xed   :  { %915 = vadd.xlane.f32.xlu1 %v914_v48  ;;  %875 = vadd.xlane.f32.xlu0 %v874_v31  ;;  %1327 = vpow2.f32 %v767_v53  ;;  %v390_v26 = vadd.f32 %v1316_v29, %v382_v43  ;;  %v637_v54 = vmul.f32 -12.0, %v1961_v50  ;;  %v1978_v4 = vmul.f32 %v383_v16, %v383_v16  ;;  %v1320_v48 = vpop.eup %1319 }
  0xee   :  { %v1980_v33 = vmul.f32 %v387_v44, %v387_v44  ;;  %v911_v2 = vsel %vm423_vm1, %v895_v47, 0.0  ;;  %v633_v41 = vmul.f32 -12.0, %v1967_v37  ;;  %v1987_v10 = vmul.f32 %v386_v34, %v386_v34  ;;  %v1322_v46 = vpop.eup %1321 }
  0xef   :  { %v1991_v14 = vmul.f32 %v1964_v52, %v1964_v52  ;;  %v871_v6 = vsel %vm423_vm1, %v855_v30, 0.0  ;;  %v894_v11 = vmul.f32 %v886_v61, %v386_v34  ;;  %v650_v12 = vmul.f32 1.442695, %v637_v54  ;;  %v586_v34 = vpop.xlane.xlu0 %585 }
  0xf0   :  { %v632_v27 = vmul.f32 -12.0, %v1978_v4  ;;  %v1995_v16 = vadd.f32 %v1318_v63, %v381_v55  ;;  %v636_v44 = vmul.f32 -12.0, %v1980_v33  ;;  %v642_v13 = vmul.f32 1.442695, %v633_v41 }
  0xf1   :  { %900 = vadd.xlane.f32.xlu1 %v899_v57  ;;  %860 = vadd.xlane.f32.xlu0 %v859_v59  ;;  %v635_v22 = vmul.f32 -12.0, %v1987_v10  ;;  %v898_v35 = vmul.f32 %v890_v7, %v390_v26  ;;  %1329 = vpow2.f32 %v650_v12  ;;  %v634_v36 = vmul.f32 -12.0, %v1991_v14 }
  0xf2   :  { %v640_v28 = vmul.f32 1.442695, %v632_v27  ;;  %v858_v30 = vmul.f32 %v414_v49, %v390_v26  ;;  %v648_v31 = vmul.f32 1.442695, %v636_v44  ;;  %1331 = vpow2.f32 %v642_v13 }
  0xf3   :  { %v646_v1 = vmul.f32 1.442695, %v635_v22  ;;  %v908_v39 = vsel %vm423_vm1, %v894_v11, 0.0  ;;  %v868_v40 = vsel %vm423_vm1, %v854_v21, 0.0  ;;  %v2003_v60 = vadd.f32 %v1914_v9, %v586_v34  ;;  %v1324_v21 = vpop.eup %1323 }
  0xf4   :  { %1333 = vpow2.f32 %v640_v28  ;;  %v2005_v53 = vmul.f32 %v390_v26, %v390_v26  ;;  %v644_v43 = vmul.f32 1.442695, %v634_v36  ;;  %v2009_v29 = vmul.f32 %v1995_v16, %v1995_v16 }
  0xf5   :  { %912 = vadd.xlane.f32.xlu1 %v911_v2  ;;  %872 = vadd.xlane.f32.xlu0 %v871_v6  ;;  %1335 = vpow2.f32 %v648_v31  ;;  %v777_v47 = vmul.f32 0.5, %v1322_v46  ;;  %v769_v55 = vmul.f32 1.442695, %v755_v23  ;;  %v2011_v57 = vmul.f32 %v414_v49, %v414_v49  ;;  %v885_v49 = vld [vmem:[%s2283_s7 + $0x10] sm:$0xff] }
  0xf6   :  { %1337 = vpow2.f32 %v646_v1  ;;  %v920_v59 = vsel %vm423_vm1, %v898_v35, 0.0  ;;  %v880_v9 = vsel %vm423_vm1, %v858_v30, 0.0  ;;  %v517_v61 = vmul.f32 0.6931472, %v1320_v48 }
  0xf7   :  { %1339 = vlog2.f32 %v1871_v5  ;;  %v639_v26 = vmul.f32 -12.0, %v2005_v53  ;;  %v853_v2 = vmul.f32 %v1758_v18, %v1964_v52  ;;  %v638_v23 = vmul.f32 -12.0, %v2009_v29 }
  0xf8   :  { %1341 = vpow2.f32 %v644_v43  ;;  %v785_v7 = vadd.f32 0.5, %v777_v47  ;;  %v756_v5 = vmul.f32 -12.0, %v2011_v57  ;;  %v536_v41 = vsel %vm423_vm1, %v517_v61, 0.0 }
  0xf9   :  { %909 = vadd.xlane.f32.xlu1 %v908_v39  ;;  %869 = vadd.xlane.f32.xlu0 %v868_v40  ;;  %v1326_v63 = vpop.eup %1325  ;;  %1343 = vpow2.f32 %v769_v55  ;;  %v467_v6 = vmul.f32 %v1893_v51, %v1893_v51  ;;  %v422_v18 = vmul.f32 %v1938_v3, %v1938_v3  ;;  %v654_v11 = vmul.f32 1.442695, %v639_v26 }
  0xfa   :  { %v1328_v54 = vpop.eup %1327  ;;  %1345 = vlog2.f32 %v1898_v45  ;;  %v865_v12 = vsel %vm423_vm1, %v853_v2, 0.0  ;;  %v893_v27 = vmul.f32 %v885_v49, %v1964_v52  ;;  %v652_v44 = vmul.f32 1.442695, %v638_v23 }
  0xfb   :  { %1347 = vlog2.f32 %v1932_v25  ;;  %v771_v22 = vmul.f32 1.442695, %v756_v5  ;;  %v487_v51 = vsel %vm423_vm1, %v467_v6, 0.0  ;;  %v778_v3 = vmul.f32 0.5, %v1328_v54 }
  0xfc   :  { %1349 = vlog2.f32 %v785_v7  ;;  %v445_v36 = vsel %vm423_vm1, %v422_v18, 0.0  ;;  %v857_v52 = vmul.f32 %v1942_v20, %v1995_v16  ;;  %v905_v48 = vsel %vm423_vm1, %v893_v27, 0.0 }
  0xfd   :  { %921 = vadd.xlane.f32.xlu1 %v920_v59  ;;  %881 = vadd.xlane.f32.xlu0 %v880_v9  ;;  %1351 = vlog2.f32 %v1857_v32  ;;  %v889_v32 = vld [vmem:[%s2283_s7 + $0x30] sm:$0xff]  ;;  %v569_v34 = vmul.f32 0.6931472, %v1324_v21  ;;  %v744_v46 = vmul.f32 -0.5, %v1846_v62  ;;  %v796_v20 = vmul.f32 0.6931472, %v1326_v63 }
  0xfe   :  { %v1330_v13 = vpop.eup %1329  ;;  %1353 = vpow2.f32 %v654_v11  ;;  %v786_v43 = vadd.f32 0.5, %v778_v3  ;;  %v877_v55 = vsel %vm423_vm1, %v857_v52, 0.0  ;;  %v897_v9 = vmul.f32 %v889_v32, %v1995_v16 }
  0xff   :  { %v1332_v35 = vpop.eup %1331  ;;  %v661_v45 = vmul.f32 0.5, %v1330_v13  ;;  %1355 = vpow2.f32 %v652_v44  ;;  %v587_v21 = vsel %vm423_vm1, %v569_v34, 0.0  ;;  %v808_v2 = vadd.f32 %v796_v20, %v744_v46 }
 0x100   :  { %1357 = vpow2.f32 %v771_v22  ;;  %v657_v59 = vmul.f32 0.5, %v1332_v35  ;;  %v917_v7 = vsel %vm423_vm1, %v897_v9, 0.0  ;;  %v468_v27 = vmul.f32 %v1920_v0, %v1920_v0 }
 0x101   :  { %537 = vadd.xlane.f32.xlu1 %v536_v41  ;;  %866 = vadd.xlane.f32.xlu0 %v865_v12  ;;  %v1334_v28 = vpop.eup %1333  ;;  %v669_v30 = vadd.f32 0.5, %v661_v45  ;;  %v822_v11 = vsel %vm423_vm1, %v808_v2, 0.0  ;;  %v745_v45 = vmul.f32 -0.5, %v1881_v17  ;;  %v629_v20 = vmul.f32 -0.5, %v1961_v50 }
 0x102   :  { %v1336_v25 = vpop.eup %1335  ;;  %v656_v31 = vmul.f32 0.5, %v1334_v28  ;;  %v665_v49 = vadd.f32 0.5, %v657_v59 }
 0x103   :  { %v1338_v1 = vpop.eup %1337  ;;  %v660_v39 = vmul.f32 0.5, %v1336_v25  ;;  %1359 = vlog2.f32 %v669_v30  ;;  %v490_v25 = vsel %vm423_vm1, %v468_v27, 0.0  ;;  %v627_v27 = vmul.f32 -0.5, %v1987_v10 }
 0x104   :  { %v664_v40 = vadd.f32 0.5, %v656_v31  ;;  %v1340_v47 = vpop.eup %1339  ;;  %v659_v26 = vmul.f32 0.5, %v1338_v1 }
 0x105   :  { %906 = vadd.xlane.f32.xlu1 %v905_v48  ;;  %488 = vadd.xlane.f32.xlu0 %v487_v51  ;;  %v668_v61 = vadd.f32 0.5, %v660_v39  ;;  %v1342_v54 = vpop.eup %1341  ;;  %v519_v63 = vmul.f32 0.6931472, %v1340_v47 }
 0x106   :  { %1361 = vlog2.f32 %v664_v40  ;;  %v1344_v62 = vpop.eup %1343  ;;  %v667_v16 = vadd.f32 0.5, %v659_v26  ;;  %v658_v5 = vmul.f32 0.5, %v1342_v54 }
 0x107   :  { %1363 = vlog2.f32 %v1863_v58  ;;  %v1346_v23 = vpop.eup %1345  ;;  %v779_v6 = vmul.f32 0.5, %v1344_v62  ;;  %v539_v58 = vsel %vm423_vm1, %v519_v63, 0.0  ;;  %v746_v62 = vmul.f32 -0.5, %v1895_v24 }
 0x108   :  { %1365 = vlog2.f32 %v786_v43  ;;  %v1348_v41 = vpop.eup %1347  ;;  %v521_v12 = vmul.f32 0.6931472, %v1346_v23  ;;  %v666_v22 = vadd.f32 0.5, %v658_v5  ;;  %v628_v24 = vmul.f32 -0.5, %v1980_v33 }
 0x109   :  { %446 = vadd.xlane.f32.xlu1 %v445_v36  ;;  %878 = vadd.xlane.f32.xlu0 %v877_v55  ;;  %1367 = vlog2.f32 %v668_v61  ;;  %v1350_v18 = vpop.eup %1349  ;;  %v523_v51 = vmul.f32 0.6931472, %v1348_v41  ;;  %v787_v28 = vadd.f32 0.5, %v779_v6 }
 0x10a   :  { %v1352_v44 = vpop.eup %1351  ;;  %1369 = vlog2.f32 %v665_v49  ;;  %v798_v3 = vmul.f32 0.6931472, %v1350_v18  ;;  %v542_v52 = vsel %vm423_vm1, %v521_v12, 0.0  ;;  %v625_v12 = vmul.f32 -0.5, %v1967_v37 }
 0x10b   :  { %v1354_v13 = vpop.eup %1353  ;;  %1371 = vlog2.f32 %v667_v16  ;;  %v571_v48 = vmul.f32 0.6931472, %v1352_v44  ;;  %v545_v34 = vsel %vm423_vm1, %v523_v51, 0.0  ;;  %v747_v51 = vmul.f32 -0.5, %v1956_v42 }
 0x10c   :  { %v1356_v35 = vpop.eup %1355  ;;  %v663_v30 = vmul.f32 0.5, %v1354_v13  ;;  %1373 = vlog2.f32 %v666_v22  ;;  %v809_v46 = vadd.f32 %v798_v3, %v745_v45 }
 0x10d   :  { %918 = vadd.xlane.f32.xlu1 %v917_v7  ;;  %588 = vadd.xlane.f32.xlu0 %v587_v21  ;;  %v1358_v36 = vpop.eup %1357  ;;  %v662_v1 = vmul.f32 0.5, %v1356_v35  ;;  %1375 = vlog2.f32 %v787_v28  ;;  %v590_v39 = vsel %vm423_vm1, %v571_v48, 0.0  ;;  %v624_v21 = vmul.f32 -0.5, %v1978_v4 }
 0x10e   :  { %1377 = vlog2.f32 %v1887_v38  ;;  %v780_v40 = vmul.f32 0.5, %v1358_v36  ;;  %v671_v47 = vadd.f32 0.5, %v663_v30  ;;  %v825_v26 = vsel %vm423_vm1, %v809_v46, 0.0 }
 0x10f   :  { %v670_v9 = vadd.f32 0.5, %v662_v1  ;;  %1379 = vlog2.f32 %v1908_v56  ;;  %v626_v28 = vmul.f32 -0.5, %v1991_v14  ;;  %v748_v46 = vmul.f32 -0.5, %v2011_v57 }
 0x110   :  { %v1360_v0 = vpop.eup %1359  ;;  %v788_v38 = vadd.f32 0.5, %v780_v40  ;;  %1381 = vlog2.f32 %v671_v47 }
 0x111   :  { %540 = vadd.xlane.f32.xlu1 %v539_v58  ;;  %823 = vadd.xlane.f32.xlu0 %v822_v11  ;;  %v683_v31 = vmul.f32 0.6931472, %v1360_v0  ;;  %1383 = vlog2.f32 %v670_v9 }
 0x112   :  { %1385 = vlog2.f32 %v788_v38 }
 0x113   :  { %v1362_v32 = vpop.eup %1361  ;;  %v693_v55 = vadd.f32 %v683_v31, %v629_v20  ;;  %v630_v20 = vmul.f32 -0.5, %v2009_v29 }
 0x114   :  { %v1364_v17 = vpop.eup %1363  ;;  %v673_v59 = vmul.f32 0.6931472, %v1362_v32 }
 0x115   :  { %543 = vadd.xlane.f32.xlu1 %v542_v52  ;;  %491 = vadd.xlane.f32.xlu0 %v490_v25  ;;  %v1366_v43 = vpop.eup %1365  ;;  %v573_v54 = vmul.f32 0.6931472, %v1364_v17  ;;  %v711_v2 = vsel %vm423_vm1, %v693_v55, 0.0 }
 0x116   :  { %v1368_v61 = vpop.eup %1367  ;;  %v800_v63 = vmul.f32 0.6931472, %v1366_v43  ;;  %v688_v23 = vadd.f32 %v673_v59, %v624_v21 }
 0x117   :  { %v1370_v50 = vpop.eup %1369  ;;  %v681_v49 = vmul.f32 0.6931472, %v1368_v61  ;;  %v593_v16 = vsel %vm423_vm1, %v573_v54, 0.0  ;;  %v2085_v61 = vpop.xlane.xlu0 %817 }
 0x118   :  { %v1372_v7 = vpop.eup %1371  ;;  %v810_v5 = vadd.f32 %v800_v63, %v746_v62  ;;  %v696_v4 = vsel %vm423_vm1, %v688_v23, 0.0  ;;  %v675_v41 = vmul.f32 0.6931472, %v1370_v50 }
 0x119   :  { %546 = vadd.xlane.f32.xlu1 %v545_v34  ;;  %591 = vadd.xlane.f32.xlu0 %v590_v39  ;;  %v692_v56 = vadd.f32 %v681_v49, %v628_v24  ;;  %v679_v6 = vmul.f32 0.6931472, %v1372_v7  ;;  %v1374_v18 = vpop.eup %1373  ;;  %v631_v39 = vmul.f32 -0.5, %v2005_v53  ;;  %v2087_v53 = vpop.xlane.xlu1 %814 }
 0x11a   :  { %v1376_v58 = vpop.eup %1375  ;;  %v828_v11 = vsel %vm423_vm1, %v810_v5, 0.0  ;;  %v689_v33 = vadd.f32 %v675_v41, %v625_v12  ;;  %v677_v35 = vmul.f32 0.6931472, %v1374_v18 }
 0x11b   :  { %v1378_v44 = vpop.eup %1377  ;;  %v708_v13 = vsel %vm423_vm1, %v692_v56, 0.0  ;;  %v691_v22 = vadd.f32 %v679_v6, %v627_v27  ;;  %v802_v45 = vmul.f32 0.6931472, %v1376_v58  ;;  %v2089_v29 = vpop.xlane.xlu0 %820 }
 0x11c   :  { %v575_v3 = vmul.f32 0.6931472, %v1378_v44  ;;  %v1380_v36 = vpop.eup %1379  ;;  %v699_v37 = vsel %vm423_vm1, %v689_v33, 0.0  ;;  %v690_v25 = vadd.f32 %v677_v35, %v626_v28 }
 0x11d   :  { %712 = vadd.xlane.f32.xlu1 %v711_v2  ;;  %826 = vadd.xlane.f32.xlu0 %v825_v26  ;;  %v1382_v52 = vpop.eup %1381  ;;  %v705_v10 = vsel %vm423_vm1, %v691_v22, 0.0  ;;  %v811_v0 = vadd.f32 %v802_v45, %v747_v51  ;;  %v577_v31 = vmul.f32 0.6931472, %v1380_v36 }
 0x11e   :  { %v1384_v48 = vpop.eup %1383  ;;  %v596_v30 = vsel %vm423_vm1, %v575_v3, 0.0  ;;  %v702_v42 = vsel %vm423_vm1, %v690_v25, 0.0  ;;  %v687_v32 = vmul.f32 0.6931472, %v1382_v52 }
 0x11f   :  { %v1386_v1 = vpop.eup %1385  ;;  %v685_v34 = vmul.f32 0.6931472, %v1384_v48  ;;  %v831_v14 = vsel %vm423_vm1, %v811_v0, 0.0  ;;  %v599_v17 = vsel %vm423_vm1, %v577_v31, 0.0 }
 0x120   :  { %v804_v40 = vmul.f32 0.6931472, %v1386_v1  ;;  %v695_v43 = vadd.f32 %v687_v32, %v631_v39 }
 0x121   :  { %594 = vadd.xlane.f32.xlu0 %v593_v16  ;;  %697 = vadd.xlane.f32.xlu1 %v696_v4  ;;  %v694_v47 = vadd.f32 %v685_v34, %v630_v20 }
 0x122   :  { %v812_v55 = vadd.f32 %v804_v40, %v748_v46  ;;  %v717_v59 = vsel %vm423_vm1, %v695_v43, 0.0 }
 0x123   :  { %v714_v9 = vsel %vm423_vm1, %v694_v47, 0.0 }
 0x124   :  { %v834_v57 = vsel %vm423_vm1, %v812_v55, 0.0 }
 0x125   :  { %829 = vadd.xlane.f32.xlu0 %v828_v11  ;;  %709 = vadd.xlane.f32.xlu1 %v708_v13 }
 0x129   :  { %700 = vadd.xlane.f32.xlu0 %v699_v37  ;;  %706 = vadd.xlane.f32.xlu1 %v705_v10 }
 0x12d   :  { %597 = vadd.xlane.f32.xlu0 %v596_v30  ;;  %703 = vadd.xlane.f32.xlu1 %v702_v42 }
 0x131   :  { %832 = vadd.xlane.f32.xlu0 %v831_v14  ;;  %600 = vadd.xlane.f32.xlu1 %v599_v17 }
 0x135   :  { %718 = vadd.xlane.f32.xlu0 %v717_v59  ;;  %715 = vadd.xlane.f32.xlu1 %v714_v9 }
 0x139   :  { %835 = vadd.xlane.f32.xlu1 %v834_v57 }
 0x172   :  { %v2091_v26 = vpop.xlane.xlu1 %903  ;;  %v2093_v54 = vpop.xlane.xlu0 %863 }
 0x173   :  { %v1012_v62 = vsub.f32 0.0, %v2091_v26  ;;  %v924_v21 = vsub.f32 0.0, %v2093_v54 }
 0x175   :  { %v1028_v50 = vand.u32 2147483647, %v1012_v62  ;;  %v940_v2 = vand.u32 2147483647, %v924_v21 }
 0x176   :  { %v2097_v63 = vpop.xlane.xlu1 %915  ;;  %v2099_v38 = vpop.xlane.xlu0 %875 }
 0x177   :  { %v1016_v23 = vsub.f32 0.0, %v2097_v63  ;;  %v1036_v16 = vsub.f32 0.0, %v1028_v50  ;;  %v928_v5 = vsub.f32 0.0, %v2099_v38  ;;  %v948_v56 = vsub.f32 0.0, %v940_v2 }
 0x179   :  { %v1032_v18 = vand.u32 2147483647, %v1016_v23  ;;  %v1045_v12 = vmul.f32 1.442695, %v1036_v16  ;;  %v944_v27 = vand.u32 2147483647, %v928_v5 }
 0x17a   :  { %v2106_v49 = vpop.xlane.xlu1 %900  ;;  %v2108_v7 = vpop.xlane.xlu0 %860  ;;  %v957_v22 = vmul.f32 1.442695, %v948_v56 }
 0x17b   :  { %v1011_v24 = vsub.f32 0.0, %v2106_v49  ;;  %v923_v4 = vsub.f32 0.0, %v2108_v7  ;;  %v1040_v51 = vsub.f32 0.0, %v1032_v18  ;;  %1387 = vpow2.f32 %v1045_v12 }
 0x17c   :  { %v952_v28 = vsub.f32 0.0, %v944_v27  ;;  %1389 = vpow2.f32 %v957_v22 }
 0x17d   :  { %v1027_v41 = vand.u32 2147483647, %v1011_v24  ;;  %v939_v6 = vand.u32 2147483647, %v923_v4  ;;  %v1053_v31 = vmul.f32 1.442695, %v1040_v51 }
 0x17e   :  { %v2119_v58 = vpop.xlane.xlu1 %912  ;;  %v2121_v11 = vpop.xlane.xlu0 %872  ;;  %v965_v32 = vmul.f32 1.442695, %v952_v28 }
 0x17f   :  { %v1035_v44 = vsub.f32 0.0, %v1027_v41  ;;  %v947_v13 = vsub.f32 0.0, %v939_v6  ;;  %v1015_v33 = vsub.f32 0.0, %v2119_v58  ;;  %v927_v35 = vsub.f32 0.0, %v2121_v11 }
 0x181   :  { %v1043_v37 = vmul.f32 1.442695, %v1035_v44  ;;  %v955_v10 = vmul.f32 1.442695, %v947_v13  ;;  %v1031_v25 = vand.u32 2147483647, %v1015_v33 }
 0x182   :  { %v2127_v45 = vpop.xlane.xlu1 %909  ;;  %v2129_v3 = vpop.xlane.xlu0 %869  ;;  %v943_v48 = vand.u32 2147483647, %v927_v35  ;;  %v2214_v49 = vmax.f32 %v927_v35, 0.0 }
 0x183   :  { %v1014_v36 = vsub.f32 0.0, %v2127_v45  ;;  %v926_v52 = vsub.f32 0.0, %v2129_v3  ;;  %1391 = vpow2.f32 %v1043_v37  ;;  %v1039_v17 = vsub.f32 0.0, %v1031_v25 }
 0x184   :  { %1393 = vpow2.f32 %v955_v10  ;;  %v951_v20 = vsub.f32 0.0, %v943_v48 }
 0x185   :  { %v1030_v0 = vand.u32 2147483647, %v1014_v36  ;;  %v942_v30 = vand.u32 2147483647, %v926_v52  ;;  %1395 = vpow2.f32 %v1053_v31  ;;  %v1051_v57 = vmul.f32 1.442695, %v1039_v17 }
 0x186   :  { %v2141_v1 = vpop.xlane.xlu1 %921  ;;  %v2143_v42 = vpop.xlane.xlu0 %881  ;;  %1397 = vpow2.f32 %v965_v32  ;;  %v963_v2 = vmul.f32 1.442695, %v951_v20 }
 0x187   :  { %v1038_v34 = vsub.f32 0.0, %v1030_v0  ;;  %v950_v14 = vsub.f32 0.0, %v942_v30  ;;  %v1018_v46 = vsub.f32 0.0, %v2141_v1  ;;  %v930_v39 = vsub.f32 0.0, %v2143_v42 }
 0x188   :  { %v1388_v27 = vpop.eup %1387 }
 0x189   :  { %v1049_v40 = vmul.f32 1.442695, %v1038_v34  ;;  %v1034_v43 = vand.u32 2147483647, %v1018_v46  ;;  %v961_v59 = vmul.f32 1.442695, %v950_v14  ;;  %v1390_v22 = vpop.eup %1389 }
 0x18a   :  { %v2149_v47 = vpop.xlane.xlu1 %537  ;;  %v2151_v55 = vpop.xlane.xlu0 %866  ;;  %v946_v50 = vand.u32 2147483647, %v930_v39  ;;  %v1060_v25 = vadd.f32 1.0, %v1388_v27  ;;  %v972_v34 = vadd.f32 1.0, %v1390_v22  ;;  %v2226_v11 = vmax.f32 %v1018_v46, 0.0 }
 0x18b   :  { %v925_v9 = vsub.f32 0.0, %v2151_v55  ;;  %v1042_v16 = vsub.f32 0.0, %v1034_v43  ;;  %1399 = vpow2.f32 %v1049_v40  ;;  %v2234_v45 = vmax.f32 %v930_v39, 0.0 }
 0x18c   :  { %1401 = vpow2.f32 %v961_v59  ;;  %v954_v44 = vsub.f32 0.0, %v946_v50 }
 0x18d   :  { %v941_v56 = vand.u32 2147483647, %v925_v9  ;;  %1403 = vpow2.f32 %v1051_v57  ;;  %v1057_v13 = vmul.f32 1.442695, %v1042_v16  ;;  %v933_v3 = vmax.f32 %v925_v9, 0.0 }
 0x18e   :  { %v2158_v41 = vpop.xlane.xlu1 %906  ;;  %v489_v6 = vpop.xlane.xlu0 %488  ;;  %1405 = vpow2.f32 %v963_v2  ;;  %v969_v30 = vmul.f32 1.442695, %v954_v44 }
 0x18f   :  { %v949_v18 = vsub.f32 0.0, %v941_v56  ;;  %v1013_v12 = vsub.f32 0.0, %v2158_v41  ;;  %1407 = vpow2.f32 %v1057_v13 }
 0x190   :  { %v1392_v32 = vpop.eup %1391 }
 0x191   :  { %v959_v51 = vmul.f32 1.442695, %v949_v18  ;;  %v1029_v28 = vand.u32 2147483647, %v1013_v12  ;;  %v1394_v17 = vpop.eup %1393  ;;  %v1059_v16 = vadd.f32 1.0, %v1392_v32  ;;  %v1021_v42 = vmax.f32 %v1013_v12, 0.0 }
 0x192   :  { %v447_v37 = vpop.xlane.xlu1 %446  ;;  %v2163_v10 = vpop.xlane.xlu0 %878  ;;  %v971_v56 = vadd.f32 1.0, %v1394_v17  ;;  %v551_v17 = vadd.f32 %v1910_v8, %v2149_v47 }
 0x193   :  { %v454_v48 = vadd.f32 %v1849_v15, %v447_v37  ;;  %v929_v0 = vsub.f32 0.0, %v2163_v10  ;;  %v1037_v31 = vsub.f32 0.0, %v1029_v28  ;;  %1409 = vpow2.f32 %v959_v51  ;;  %v1396_v59 = vpop.eup %1395 }
 0x194   :  { %1411 = vlog2.f32 %v1060_v25  ;;  %v1398_v2 = vpop.eup %1397  ;;  %v1064_v27 = vadd.f32 1.0, %v1396_v59 }
 0x195   :  { %v945_v14 = vand.u32 2147483647, %v929_v0  ;;  %v1047_v20 = vmul.f32 1.442695, %v1037_v31  ;;  %v455_v15 = vrot.slane %v454_v48, 4  ;;  %1413 = vpow2.f32 %v969_v30 }
 0x196   :  { %v2169_v40 = vpop.xlane.xlu1 %918  ;;  %v2171_v43 = vpop.xlane.xlu0 %588  ;;  %1415 = vlog2.f32 %v972_v34  ;;  %v976_v28 = vadd.f32 1.0, %v1398_v2  ;;  %v498_v30 = vadd.f32 %v1851_v19, %v489_v6  ;;  %v837_v19 = vadd.f32 %v2085_v61, %v2087_v53 }
 0x197   :  { %v953_v57 = vsub.f32 0.0, %v945_v14  ;;  %v2287_v50 = vsub.f32 0.0, %v2169_v40  ;;  %1417 = vpow2.f32 %v1047_v20  ;;  %v456_v37 = vadd.f32 %v455_v15, %v454_v48 }
 0x198   :  { %v1400_v51 = vpop.eup %1399  ;;  %v2186_v61 = vadd.f32 %v837_v19, %v2089_v29  ;;  %v2198_v29 = vmax.f32 %v1016_v23, 0.0  ;;  %v604_v46 = vadd.f32 %v2003_v60, %v2171_v43  ;;  %v937_v39 = vmax.f32 %v929_v0, 0.0 }
 0x199   :  { %v967_v18 = vmul.f32 1.442695, %v953_v57  ;;  %v1033_v44 = vand.u32 2147483647, %v2287_v50  ;;  %v1402_v25 = vpop.eup %1401  ;;  %v1062_v14 = vadd.f32 1.0, %v1400_v51  ;;  %v457_v48 = vrot.slane %v456_v37, 2 }
 0x19a   :  { %v541_v13 = vpop.xlane.xlu1 %540  ;;  %v2176_v22 = vpop.xlane.xlu0 %823  ;;  %v974_v2 = vadd.f32 1.0, %v1402_v25  ;;  %v2288_v41 = vsub.f32 0.0, %v2169_v40 }
 0x19b   :  { %1419 = vpow2.f32 %v967_v18  ;;  %v1041_v31 = vsub.f32 0.0, %v1033_v44  ;;  %v1404_v32 = vpop.eup %1403  ;;  %v458_v51 = vadd.f32 %v457_v48, %v456_v37  ;;  %v839_v10 = vadd.f32 %v2186_v61, %v2176_v22 }
 0x19c   :  { %1421 = vlog2.f32 %v1059_v16  ;;  %v1406_v34 = vpop.eup %1405  ;;  %v1063_v18 = vadd.f32 1.0, %v1404_v32  ;;  %v552_v16 = vadd.f32 %v551_v17, %v541_v13  ;;  %v1025_v12 = vmax.f32 %v2288_v41, 0.0 }
 0x19d   :  { %1423 = vlog2.f32 %v971_v56  ;;  %v1055_v20 = vmul.f32 1.442695, %v1041_v31  ;;  %v975_v44 = vadd.f32 1.0, %v1406_v34  ;;  %v1408_v50 = vpop.eup %1407 }
 0x19e   :  { %1425 = vlog2.f32 %v1064_v27  ;;  %v544_v59 = vpop.xlane.xlu1 %543  ;;  %v492_v57 = vpop.xlane.xlu0 %491 }
 0x19f   :  { %1427 = vlog2.f32 %v976_v28  ;;  %v499_v15 = vadd.f32 %v498_v30, %v492_v57  ;;  %v553_v6 = vadd.f32 %v552_v16, %v544_v59  ;;  %v1066_v30 = vadd.f32 1.0, %v1408_v50 }
 0x1a0   :  { %1429 = vpow2.f32 %v1055_v20  ;;  %v1410_v47 = vpop.eup %1409  ;;  %v1020_v59 = vmax.f32 %v1012_v62, 0.0  ;;  %v932_v57 = vmax.f32 %v924_v21, 0.0 }
 0x1a1   :  { %v500_v56 = vrot.slane %v499_v15, 4  ;;  %1431 = vlog2.f32 %v1062_v14  ;;  %v1412_v25 = vpop.eup %1411  ;;  %v973_v31 = vadd.f32 1.0, %v1410_v47  ;;  %v1019_v47 = vmax.f32 %v1011_v24, 0.0 }
 0x1a2   :  { %v547_v27 = vpop.xlane.xlu1 %546  ;;  %v2183_v8 = vpop.xlane.xlu0 %591  ;;  %1433 = vlog2.f32 %v974_v2  ;;  %v459_v2 = vrot.slane %v458_v51, 1  ;;  %v1070_v54 = vmul.f32 0.6931472, %v1412_v25  ;;  %v2210_v25 = vmax.f32 %v1015_v33, 0.0 }
 0x1a3   :  { %v501_v28 = vadd.f32 %v500_v56, %v499_v15  ;;  %1435 = vlog2.f32 %v1063_v18  ;;  %v554_v32 = vadd.f32 %v553_v6, %v547_v27  ;;  %v1414_v13 = vpop.eup %1413  ;;  %v936_v56 = vmax.f32 %v928_v5, 0.0 }
 0x1a4   :  { %1437 = vlog2.f32 %v975_v44  ;;  %v1416_v17 = vpop.eup %1415  ;;  %v978_v15 = vadd.f32 1.0, %v1414_v13  ;;  %v931_v5 = vmax.f32 %v923_v4, 0.0  ;;  %v1022_v33 = vmax.f32 %v1014_v36, 0.0 }
 0x1a5   :  { %v502_v34 = vrot.slane %v501_v28, 2  ;;  %1439 = vlog2.f32 %v973_v31  ;;  %v555_v53 = vrot.slane %v554_v32, 4  ;;  %v1418_v37 = vpop.eup %1417  ;;  %v982_v21 = vmul.f32 0.6931472, %v1416_v17 }
 0x1a6   :  { %v2188_v14 = vpop.xlane.xlu1 %712  ;;  %v2190_v20 = vpop.xlane.xlu0 %826  ;;  %v1061_v18 = vadd.f32 1.0, %v1418_v37  ;;  %1441 = vlog2.f32 %v1066_v30  ;;  %v605_v43 = vadd.f32 %v604_v46, %v2183_v8 }
 0x1a7   :  { %v503_v50 = vadd.f32 %v502_v34, %v501_v28  ;;  %v556_v16 = vadd.f32 %v555_v53, %v554_v32  ;;  %v460_v28 = vadd.f32 %v459_v2, %v458_v51  ;;  %v1084_v51 = vadd.f32 %v1070_v54, %v1020_v59 }
 0x1a8   :  { %v1420_v48 = vpop.eup %1419  ;;  %1443 = vlog2.f32 %v1061_v18  ;;  %v996_v17 = vadd.f32 %v982_v21, %v932_v57  ;;  %v934_v2 = vmax.f32 %v926_v52, 0.0 }
 0x1a9   :  { %v1422_v44 = vpop.eup %1421  ;;  %v977_v26 = vadd.f32 1.0, %v1420_v48  ;;  %v504_v62 = vrot.slane %v503_v50, 1  ;;  %v557_v6 = vrot.slane %v556_v16, 2  ;;  %v1092_v52 = vsub.f32 0.0, %v1084_v51 }
 0x1aa   :  { %v1424_v19 = vpop.eup %1423  ;;  %v2202_v27 = vpop.xlane.xlu0 %594  ;;  %v1068_v30 = vmul.f32 0.6931472, %v1422_v44  ;;  %v1004_v1 = vsub.f32 0.0, %v996_v17 }
 0x1ab   :  { %v698_v63 = vpop.xlane.xlu1 %697  ;;  %v1426_v23 = vpop.eup %1425  ;;  %1445 = vlog2.f32 %v977_v26  ;;  %v505_v31 = vadd.f32 %v504_v62, %v503_v50  ;;  %v558_v32 = vadd.f32 %v557_v6, %v556_v16  ;;  %v980_v34 = vmul.f32 0.6931472, %v1424_v19 }
 0x1ac   :  { %v1428_v38 = vpop.eup %1427  ;;  %1447 = vlog2.f32 %v978_v15  ;;  %v1078_v57 = vmul.f32 0.6931472, %v1426_v23  ;;  %v1083_v18 = vadd.f32 %v1068_v30, %v1019_v47  ;;  %v606_v8 = vadd.f32 %v605_v43, %v2202_v27 }
 0x1ad   :  { %v1430_v13 = vpop.eup %1429  ;;  %v506_v24 = vadd.f32 %v505_v31, %v460_v28  ;;  %v559_v37 = vrot.slane %v558_v32, 1  ;;  %v990_v50 = vmul.f32 0.6931472, %v1428_v38  ;;  %v995_v16 = vadd.f32 %v980_v34, %v931_v5 }
 0x1ae   :  { %v1065_v53 = vadd.f32 1.0, %v1430_v13  ;;  %v2216_v7 = vpop.xlane.xlu0 %829  ;;  %v1432_v58 = vpop.eup %1431  ;;  %v2247_v55 = vadd.f32 %v1078_v57, %v2198_v29  ;;  %v1091_v6 = vsub.f32 0.0, %v1083_v18  ;;  %v1100_v38 = vadd.f32 %v1092_v52, %v1004_v1 }
 0x1af   :  { %v2218_v4 = vpop.xlane.xlu1 %709  ;;  %v2228_v35 = vmul.f32 -0.5, %v506_v24  ;;  %v1434_v59 = vpop.eup %1433  ;;  %v2230_v48 = vadd.f32 %v559_v37, %v558_v32  ;;  %v1074_v54 = vmul.f32 0.6931472, %v1432_v58  ;;  %v2249_v9 = vadd.f32 %v990_v50, %v936_v56 }
 0x1b0   :  { %1449 = vlog2.f32 %v1065_v53  ;;  %v1436_v15 = vpop.eup %1435  ;;  %v986_v21 = vmul.f32 0.6931472, %v1434_v59  ;;  %v1003_v23 = vsub.f32 0.0, %v995_v16  ;;  %v840_v27 = vadd.f32 %v839_v10, %v2190_v20 }
 0x1b1   :  { %v1438_v36 = vpop.eup %1437  ;;  %v561_v44 = vsub.f32 %v2228_v35, %v2230_v48  ;;  %v1076_v47 = vmul.f32 0.6931472, %v1436_v15  ;;  %v1086_v32 = vadd.f32 %v1074_v54, %v1022_v33  ;;  %v1008_v24 = vsub.f32 0.0, %v2249_v9 }
 0x1b2   :  { %v701_v26 = vpop.xlane.xlu0 %700  ;;  %v1440_v19 = vpop.eup %1439  ;;  %v988_v5 = vmul.f32 0.6931472, %v1438_v36  ;;  %v998_v13 = vadd.f32 %v986_v21, %v934_v2  ;;  %v1099_v53 = vadd.f32 %v1091_v6, %v1003_v23  ;;  %v841_v9 = vadd.f32 %v840_v27, %v2216_v7 }
 0x1b3   :  { %v707_v62 = vpop.xlane.xlu1 %706  ;;  %v984_v60 = vmul.f32 0.6931472, %v1440_v19  ;;  %v720_v28 = vadd.f32 %v701_v26, %v698_v63  ;;  %v1442_v31 = vpop.eup %1441  ;;  %v1096_v63 = vsub.f32 0.0, %v2247_v55  ;;  %v1087_v37 = vadd.f32 %v1076_v47, %v2210_v25 }
 0x1b4   :  { %v999_v58 = vadd.f32 %v988_v5, %v2214_v49  ;;  %v1094_v50 = vsub.f32 0.0, %v1086_v32  ;;  %v1006_v15 = vsub.f32 0.0, %v998_v13  ;;  %v1107_v46 = vadd.f32 %v1100_v38, %v1099_v53 }
 0x1b5   :  { %v1444_v56 = vpop.eup %1443  ;;  %v997_v51 = vadd.f32 %v984_v60, %v933_v3  ;;  %v1082_v3 = vmul.f32 0.6931472, %v1442_v31  ;;  %v1095_v26 = vsub.f32 0.0, %v1087_v37 }
 0x1b6   :  { %v598_v0 = vpop.xlane.xlu0 %597  ;;  %v1072_v17 = vmul.f32 0.6931472, %v1444_v56  ;;  %v1007_v19 = vsub.f32 0.0, %v999_v58  ;;  %v1102_v55 = vadd.f32 %v1094_v50, %v1006_v15 }
 0x1b7   :  { %v704_v29 = vpop.xlane.xlu1 %703  ;;  %v607_v22 = vadd.f32 %v606_v8, %v598_v0  ;;  %v1005_v52 = vsub.f32 0.0, %v997_v51  ;;  %v1090_v43 = vadd.f32 %v1082_v3, %v2226_v11 }
 0x1b8   :  { %v721_v30 = vadd.f32 %v720_v28, %v704_v29  ;;  %v1446_v34 = vpop.eup %1445  ;;  %v1085_v33 = vadd.f32 %v1072_v17, %v1021_v42  ;;  %v1103_v5 = vadd.f32 %v1095_v26, %v1007_v19  ;;  %v1104_v29 = vadd.f32 %v1096_v63, %v1008_v24 }
 0x1b9   :  { %v1448_v40 = vpop.eup %1447  ;;  %v992_v2 = vmul.f32 0.6931472, %v1446_v34  ;;  %v1098_v13 = vsub.f32 0.0, %v1090_v43 }
 0x1ba   :  { %v722_v61 = vadd.f32 %v721_v30, %v707_v62  ;;  %v833_v59 = vpop.xlane.xlu0 %832  ;;  %v994_v36 = vmul.f32 0.6931472, %v1448_v40  ;;  %v1093_v1 = vsub.f32 0.0, %v1085_v33 }
 0x1bb   :  { %v601_v57 = vpop.xlane.xlu1 %600  ;;  %v1001_v20 = vadd.f32 %v992_v2, %v937_v39  ;;  %v842_v31 = vadd.f32 %v841_v9, %v833_v59 }
 0x1bc   :  { %v608_v18 = vadd.f32 %v607_v22, %v601_v57  ;;  %v723_v16 = vadd.f32 %v722_v61, %v2218_v4  ;;  %v1101_v54 = vadd.f32 %v1093_v1, %v1005_v52  ;;  %v1002_v6 = vadd.f32 %v994_v36, %v2234_v45 }
 0x1bd   :  { %v1450_v25 = vpop.eup %1449  ;;  %v1009_v39 = vsub.f32 0.0, %v1001_v20  ;;  %v1121_v36 = vstv %s2276_s0 }
 0x1be   :  { %v609_v62 = vrot.slane %v608_v18, 4  ;;  %v724_v49 = vadd.f32 %v723_v16, %v2188_v14  ;;  %v1080_v21 = vmul.f32 0.6931472, %v1450_v25  ;;  %v1108_v23 = vadd.f32 %v1107_v46, %v1101_v54  ;;  %v719_v28 = vpop.xlane.xlu0 %718 }
 0x1bf   :  { %v716_v42 = vpop.xlane.xlu1 %715  ;;  %v1010_v8 = vsub.f32 0.0, %v1002_v6 }
 0x1c0   :  { %v610_v60 = vadd.f32 %v609_v62, %v608_v18  ;;  %v725_v4 = vadd.f32 %v724_v49, %v716_v42  ;;  %v1089_v47 = vadd.f32 %v1080_v21, %v1025_v12  ;;  %v1109_v41 = vadd.f32 %v1108_v23, %v1102_v55 }
 0x1c1   :  { %v1106_v37 = vadd.f32 %v1098_v13, %v1010_v8 }
 0x1c2   :  { %v611_v38 = vrot.slane %v610_v60, 2  ;;  %v726_v14 = vadd.f32 %v725_v4, %v719_v28  ;;  %v1097_v10 = vsub.f32 0.0, %v1089_v47  ;;  %v1110_v30 = vadd.f32 %v1109_v41, %v1103_v5 }
 0x1c3   :  { %v836_v0 = vpop.xlane.xlu1 %835 }
 0x1c4   :  { %v612_v56 = vadd.f32 %v611_v38, %v610_v60  ;;  %v727_v7 = vrot.slane %v726_v14, 4  ;;  %v843_v32 = vadd.f32 %v842_v31, %v836_v0  ;;  %v1105_v11 = vadd.f32 %v1097_v10, %v1009_v39 }
 0x1c5   :  { %v1111_v51 = vadd.f32 %v1110_v30, %v1104_v29 }
 0x1c6   :  { %v613_v45 = vrot.slane %v612_v56, 1  ;;  %v728_v34 = vadd.f32 %v727_v7, %v726_v14  ;;  %v844_v12 = vrot.slane %v843_v32, 4 }
 0x1c7   :  { %v1112_v22 = vadd.f32 %v1111_v51, %v1105_v11 }
 0x1c8   :  { %v614_v17 = vadd.f32 %v613_v45, %v612_v56  ;;  %v729_v40 = vrot.slane %v728_v34, 2  ;;  %v845_v53 = vadd.f32 %v844_v12, %v843_v32 }
 0x1c9   :  { %v1113_v58 = vadd.f32 %v1112_v22, %v1106_v37 }
 0x1ca   :  { %v615_v63 = vsub.f32 %v561_v44, %v614_v17  ;;  %v730_v24 = vadd.f32 %v729_v40, %v728_v34  ;;  %v846_v61 = vrot.slane %v845_v53, 2 }
 0x1cb   :  { %v1114_v27 = vrot.slane %v1113_v58, 4 }
 0x1cc   :  { %v731_v33 = vrot.slane %v730_v24, 1  ;;  %v847_v2 = vadd.f32 %v846_v61, %v845_v53 }
 0x1cd   :  { %v1115_v57 = vadd.f32 %v1114_v27, %v1113_v58 }
 0x1ce   :  { %v848_v59 = vrot.slane %v847_v2, 1  ;;  %v732_v50 = vadd.f32 %v731_v33, %v730_v24 }
 0x1cf   :  { %v1116_v18 = vrot.slane %v1115_v57, 2 }
 0x1d0   :  { %v849_v15 = vadd.f32 %v848_v59, %v847_v2 }
 0x1d1   :  { %v1117_v3 = vadd.f32 %v1116_v18, %v1115_v57 }
 0x1d2   :  { %v850_v16 = vadd.f32 %v849_v15, %v732_v50 }
 0x1d3   :  { %v1118_v35 = vrot.slane %v1117_v3, 1 }
 0x1d4   :  { %v1120_v52 = vsub.f32 %v615_v63, %v850_v16 }
 0x1d5   :  { %v1119_v44 = vadd.f32 %v1118_v35, %v1117_v3 }
 0x1d6   :  { %v1122_v48 = vmul.f32 %v1121_v36, %v1120_v52 }
 0x1d8   :  { %v1123_v1 = vsub.f32 %v1122_v48, %v1119_v44 }
 0x1da   :  { %v1124_v25 = vmul.f32 0.015625, %v1123_v1 }
 0x1dc   :  { %1126 = vst.msk [vmem:[#allocation3] sm:$0x1] %vm1125_vm2, %v1124_v25 }
 0x1dd   :  { %1462 = shalt.err (!%p1459_p4)
}
 0x1de   :  { %1136 = dma.vmem_to_hbm [thread:$0]  %s1134_s28, 16, %s2286_s10, [#allocation4]  }
 0x1df   :  { %1471 = dma.done.wait [#allocation4], 16  }
 0x1e0   :  { %1472 = vsyncadd [#allocation4], 4294967280 }
 0x1e1   :  { %1140 = vsyncpa [#allocation4], 1 }

</bundles_post_ra>
